<compile_context>
chip_gen: v7x
topology: tpu7x:2x2x1
jax: 0.10.0
libtpu: 0.0.40
codegen_flags: <defaults>
</compile_context>

<pallas_src>
import functools

import jax
import jax.numpy as jnp
import numpy as np
from jax.experimental import pallas as pl
from jax.experimental.pallas import tpu as pltpu


def _round_up(n, m=128):
    return ((n + m - 1) // m) * m


def rnn_model_kernel(x_ref, wemb_ref, wih_ref, whh_ref, brnn_ref,
                     w1_ref, b1_ref, w2_ref, b2_ref, out_ref, *, B, S):
    # x_ref:   (B*S, IN)   f32   (row index = b*S + s, batch-major)
    # wemb:    (IN, Ep)    bf16  (embedding, no bias)
    # wih:     (Ep, Hp)    bf16   whh: (Hp, Hp) bf16
    # brnn:    (1, Hp)     f32   (= b_ih + b_hh)
    # w1:      (Hp, D1p)   bf16   b1: (1, D1p) f32
    # w2:      (D1p, OUTp) bf16   b2: (1, OUTp) f32
    # out_ref: (B, OUTp)   f32
    Hp = whh_ref.shape[0]
    whh = whh_ref[...]

    # ---- hoisted input projection over ALL timesteps (M = B*S on the MXU) --
    et = jnp.dot(x_ref[...], wemb_ref[...],
                 preferred_element_type=jnp.float32)              # (B*S, Ep)
    pre_ih = (jnp.dot(et, wih_ref[...],
                      preferred_element_type=jnp.float32)
              + brnn_ref[...])                                    # (B*S, Hp)
    pre_ih = pre_ih.reshape(B, S, Hp)

    # ---- serial recurrence: only h @ W_hh remains on the critical path -----
    h = jnp.zeros((B, Hp), jnp.float32)
    for t in range(S):                      # S is static -> fully unrolled
        h = jnp.tanh(pre_ih[:, t, :]
                     + jnp.dot(h, whh, preferred_element_type=jnp.float32))

    # ---- head: dense1 + sigmoid, dense2 ------------------------------------
    z1 = jax.nn.sigmoid(
        jnp.dot(h, w1_ref[...], preferred_element_type=jnp.float32)
        + b1_ref[...])
    out_ref[...] = (jnp.dot(z1, w2_ref[...], preferred_element_type=jnp.float32)
                    + b2_ref[...])


def model_forward(x_bsf, params, units):
    """x_bsf: (B, S, IN) float32, batch-first like the PyTorch module."""
    IN, E, H, D1, OUT = units
    B, S, _ = x_bsf.shape
    (wemb, wih, whh, brnn, w1, b1, w2, b2) = params
    OUTp = w2.shape[1]

    # Batch-major flatten; no transpose, no sublane bloat.
    x2d = x_bsf.reshape(B * S, IN)

    flops = 2 * (B * S * IN * wemb.shape[1]          # x @ W_emb
                 + B * S * wemb.shape[1] * wih.shape[1]   # et @ W_ih
                 + S * B * whh.shape[0] * whh.shape[1]    # recurrence
                 + B * w1.shape[0] * w1.shape[1]
                 + B * w2.shape[0] * w2.shape[1])
    transcendentals = S * B * whh.shape[0] + B * w1.shape[1]
    bytes_accessed = (x2d.size * 4
                      + sum(int(p.size) * p.dtype.itemsize for p in params)
                      + B * OUTp * 4)

    vmem = pl.BlockSpec(memory_space=pltpu.MemorySpace.VMEM)
    out_padded = pl.pallas_call(
        functools.partial(rnn_model_kernel, B=B, S=S),
        out_shape=jax.ShapeDtypeStruct((B, OUTp), jnp.float32),
        in_specs=[vmem] * 9,
        out_specs=vmem,
        cost_estimate=pl.CostEstimate(flops=flops,
                                      transcendentals=transcendentals,
                                      bytes_accessed=bytes_accessed),
    )(x2d, wemb, wih, whh, brnn, w1, b1, w2, b2)
    return out_padded[:, :OUT]


def init_params(key, units):
    """Zero-padded, pre-transposed (in, out) weights; matrices in bf16."""
    IN, E, H, D1, OUT = units
    Ep, Hp, D1p, OUTp = _round_up(E), _round_up(H), _round_up(D1), _round_up(OUT)
    ks = jax.random.split(key, 9)

    def u(k, shape, fan_in):
        b = 1.0 / np.sqrt(fan_in)
        return jax.random.uniform(k, shape, jnp.float32, -b, b)

    def pad2(a, rows, cols):
        z = jnp.zeros((rows, cols), a.dtype)
        return z.at[:a.shape[0], :a.shape[1]].set(a)

    wemb = pad2(u(ks[0], (IN, E), IN), IN, Ep).astype(jnp.bfloat16)   # embedding^T
    wih = pad2(u(ks[1], (E, H), H), Ep, Hp).astype(jnp.bfloat16)      # W_ih^T
    whh = pad2(u(ks[2], (H, H), H), Hp, Hp).astype(jnp.bfloat16)      # W_hh^T
    bih = pad2(u(ks[3], (1, H), H), 1, Hp)
    bhh = pad2(u(ks[4], (1, H), H), 1, Hp)
    brnn = bih + bhh                                                  # f32 (1, Hp)
    w1 = pad2(u(ks[5], (H, D1), H), Hp, D1p).astype(jnp.bfloat16)
    b1 = pad2(u(ks[6], (1, D1), H), 1, D1p)
    w2 = pad2(u(ks[7], (D1, OUT), D1), D1p, OUTp).astype(jnp.bfloat16)
    b2 = pad2(u(ks[8], (1, OUT), D1), 1, OUTp)
    return (wemb, wih, whh, brnn, w1, b1, w2, b2)


def reference_forward(x_bsf, params, units):
    """Pure-JAX reference mirroring the PyTorch forward (uses the same
    bf16-rounded weights, computed in f32)."""
    IN, E, H, D1, OUT = units
    (wemb, wih, whh, brnn, w1, b1, w2, b2) = params
    wemb, wih, whh, w1, w2 = (a.astype(jnp.float32)
                              for a in (wemb, wih, whh, w1, w2))
    emb = x_bsf @ wemb                               # (B, S, Ep)
    B, S, _ = emb.shape
    h = jnp.zeros((B, whh.shape[0]), jnp.float32)
    for t in range(S):                               # Elman RNN, tanh
        h = jnp.tanh(emb[:, t, :] @ wih + brnn + h @ whh)
    z1 = jax.nn.sigmoid(h @ w1 + b1)
    out = z1 @ w2 + b2
    return out[:, :OUT]


if __name__ == "__main__":
    units = [1000, 300, 100, 100, 1000]              # module defaults
    B, S = 2, 8                                      # small batch / seq

    key = jax.random.PRNGKey(0)
    k_x, k_p = jax.random.split(key)
    x = jax.random.normal(k_x, (B, S, units[0]), jnp.float32)
    params = init_params(k_p, units)

    out = jax.block_until_ready(model_forward(x, params, units))

    ref = reference_forward(x, params, units)
    np.testing.assert_allclose(np.asarray(out), np.asarray(ref),
                               rtol=2e-4, atol=2e-4)
    assert out.shape == (B, units[4])
    print("KERNEL_OK")
</pallas_src>

<mosaic_0001>
module attributes {stable_mosaic.version = 11 : i64} {
  func.func @rnn_model_kernel(%arg0: memref<16x1000xf32, #tpu.memory_space<vmem>>, %arg1: memref<1000x384xbf16, #tpu.memory_space<vmem>>, %arg2: memref<384x128xbf16, #tpu.memory_space<vmem>>, %arg3: memref<128x128xbf16, #tpu.memory_space<vmem>>, %arg4: memref<1x128xf32, #tpu.memory_space<vmem>>, %arg5: memref<128x128xbf16, #tpu.memory_space<vmem>>, %arg6: memref<1x128xf32, #tpu.memory_space<vmem>>, %arg7: memref<128x1024xbf16, #tpu.memory_space<vmem>>, %arg8: memref<1x1024xf32, #tpu.memory_space<vmem>>, %arg9: memref<2x1024xf32, #tpu.memory_space<vmem>>) attributes {dimension_semantics = [], scalar_prefetch = 0 : i64, scratch_operands = 0 : i64, tpu.core_type = #tpu.core_type<tc>} {
    %c0 = arith.constant 0 : index
    %c0_0 = arith.constant 0 : index
    %0 = vector.load %arg3[%c0, %c0_0] : memref<128x128xbf16, #tpu.memory_space<vmem>>, vector<128x128xbf16>
    %c0_1 = arith.constant 0 : index
    %c0_2 = arith.constant 0 : index
    %1 = vector.load %arg0[%c0_1, %c0_2] : memref<16x1000xf32, #tpu.memory_space<vmem>>, vector<16x1000xf32>
    %c0_3 = arith.constant 0 : index
    %c0_4 = arith.constant 0 : index
    %2 = vector.load %arg1[%c0_3, %c0_4] : memref<1000x384xbf16, #tpu.memory_space<vmem>>, vector<1000x384xbf16>
    %cst = arith.constant dense<0.000000e+00> : vector<16x384xf32>
    %3 = tpu.matmul %1, %2, %cst {dimension_numbers = #tpu.dot_dimension_numbers<[1], [0], [0], [1], [0, 0, 1, 1], [], []>} : vector<16x1000xf32>, vector<1000x384xbf16>, vector<16x384xf32> -> vector<16x384xf32>
    %c0_5 = arith.constant 0 : index
    %c0_6 = arith.constant 0 : index
    %4 = vector.load %arg2[%c0_5, %c0_6] : memref<384x128xbf16, #tpu.memory_space<vmem>>, vector<384x128xbf16>
    %cst_7 = arith.constant dense<0.000000e+00> : vector<16x128xf32>
    %5 = tpu.matmul %3, %4, %cst_7 {dimension_numbers = #tpu.dot_dimension_numbers<[1], [0], [0], [1], [0, 0, 1, 1], [], []>} : vector<16x384xf32>, vector<384x128xbf16>, vector<16x128xf32> -> vector<16x128xf32>
    %c0_8 = arith.constant 0 : index
    %c0_9 = arith.constant 0 : index
    %6 = vector.load %arg4[%c0_8, %c0_9] : memref<1x128xf32, #tpu.memory_space<vmem>>, vector<1x128xf32>
    %7 = vector.broadcast %6 : vector<1x128xf32> to vector<16x128xf32>
    %8 = arith.addf %5, %7 : vector<16x128xf32>
    %9 = vector.shape_cast %8 : vector<16x128xf32> to vector<2x8x128xf32>
    %cst_10 = arith.constant 0.000000e+00 : f32
    %10 = vector.broadcast %cst_10 : f32 to vector<2x128xf32>
    %11 = vector.extract_strided_slice %9 {offsets = [0, 0, 0], sizes = [2, 1, 128], strides = [1, 1, 1]} : vector<2x8x128xf32> to vector<2x1x128xf32>
    %12 = vector.shape_cast %11 : vector<2x1x128xf32> to vector<2x128xf32>
    %cst_11 = arith.constant dense<0.000000e+00> : vector<2x128xf32>
    %13 = tpu.matmul %10, %0, %cst_11 {dimension_numbers = #tpu.dot_dimension_numbers<[1], [0], [0], [1], [0, 0, 1, 1], [], []>} : vector<2x128xf32>, vector<128x128xbf16>, vector<2x128xf32> -> vector<2x128xf32>
    %14 = arith.addf %12, %13 : vector<2x128xf32>
    %15 = math.tanh %14 : vector<2x128xf32>
    %16 = vector.extract_strided_slice %9 {offsets = [0, 1, 0], sizes = [2, 1, 128], strides = [1, 1, 1]} : vector<2x8x128xf32> to vector<2x1x128xf32>
    %17 = vector.shape_cast %16 : vector<2x1x128xf32> to vector<2x128xf32>
    %cst_12 = arith.constant dense<0.000000e+00> : vector<2x128xf32>
    %18 = tpu.matmul %15, %0, %cst_12 {dimension_numbers = #tpu.dot_dimension_numbers<[1], [0], [0], [1], [0, 0, 1, 1], [], []>} : vector<2x128xf32>, vector<128x128xbf16>, vector<2x128xf32> -> vector<2x128xf32>
    %19 = arith.addf %17, %18 : vector<2x128xf32>
    %20 = math.tanh %19 : vector<2x128xf32>
    %21 = vector.extract_strided_slice %9 {offsets = [0, 2, 0], sizes = [2, 1, 128], strides = [1, 1, 1]} : vector<2x8x128xf32> to vector<2x1x128xf32>
    %22 = vector.shape_cast %21 : vector<2x1x128xf32> to vector<2x128xf32>
    %cst_13 = arith.constant dense<0.000000e+00> : vector<2x128xf32>
    %23 = tpu.matmul %20, %0, %cst_13 {dimension_numbers = #tpu.dot_dimension_numbers<[1], [0], [0], [1], [0, 0, 1, 1], [], []>} : vector<2x128xf32>, vector<128x128xbf16>, vector<2x128xf32> -> vector<2x128xf32>
    %24 = arith.addf %22, %23 : vector<2x128xf32>
    %25 = math.tanh %24 : vector<2x128xf32>
    %26 = vector.extract_strided_slice %9 {offsets = [0, 3, 0], sizes = [2, 1, 128], strides = [1, 1, 1]} : vector<2x8x128xf32> to vector<2x1x128xf32>
    %27 = vector.shape_cast %26 : vector<2x1x128xf32> to vector<2x128xf32>
    %cst_14 = arith.constant dense<0.000000e+00> : vector<2x128xf32>
    %28 = tpu.matmul %25, %0, %cst_14 {dimension_numbers = #tpu.dot_dimension_numbers<[1], [0], [0], [1], [0, 0, 1, 1], [], []>} : vector<2x128xf32>, vector<128x128xbf16>, vector<2x128xf32> -> vector<2x128xf32>
    %29 = arith.addf %27, %28 : vector<2x128xf32>
    %30 = math.tanh %29 : vector<2x128xf32>
    %31 = vector.extract_strided_slice %9 {offsets = [0, 4, 0], sizes = [2, 1, 128], strides = [1, 1, 1]} : vector<2x8x128xf32> to vector<2x1x128xf32>
    %32 = vector.shape_cast %31 : vector<2x1x128xf32> to vector<2x128xf32>
    %cst_15 = arith.constant dense<0.000000e+00> : vector<2x128xf32>
    %33 = tpu.matmul %30, %0, %cst_15 {dimension_numbers = #tpu.dot_dimension_numbers<[1], [0], [0], [1], [0, 0, 1, 1], [], []>} : vector<2x128xf32>, vector<128x128xbf16>, vector<2x128xf32> -> vector<2x128xf32>
    %34 = arith.addf %32, %33 : vector<2x128xf32>
    %35 = math.tanh %34 : vector<2x128xf32>
    %36 = vector.extract_strided_slice %9 {offsets = [0, 5, 0], sizes = [2, 1, 128], strides = [1, 1, 1]} : vector<2x8x128xf32> to vector<2x1x128xf32>
    %37 = vector.shape_cast %36 : vector<2x1x128xf32> to vector<2x128xf32>
    %cst_16 = arith.constant dense<0.000000e+00> : vector<2x128xf32>
    %38 = tpu.matmul %35, %0, %cst_16 {dimension_numbers = #tpu.dot_dimension_numbers<[1], [0], [0], [1], [0, 0, 1, 1], [], []>} : vector<2x128xf32>, vector<128x128xbf16>, vector<2x128xf32> -> vector<2x128xf32>
    %39 = arith.addf %37, %38 : vector<2x128xf32>
    %40 = math.tanh %39 : vector<2x128xf32>
    %41 = vector.extract_strided_slice %9 {offsets = [0, 6, 0], sizes = [2, 1, 128], strides = [1, 1, 1]} : vector<2x8x128xf32> to vector<2x1x128xf32>
    %42 = vector.shape_cast %41 : vector<2x1x128xf32> to vector<2x128xf32>
    %cst_17 = arith.constant dense<0.000000e+00> : vector<2x128xf32>
    %43 = tpu.matmul %40, %0, %cst_17 {dimension_numbers = #tpu.dot_dimension_numbers<[1], [0], [0], [1], [0, 0, 1, 1], [], []>} : vector<2x128xf32>, vector<128x128xbf16>, vector<2x128xf32> -> vector<2x128xf32>
    %44 = arith.addf %42, %43 : vector<2x128xf32>
    %45 = math.tanh %44 : vector<2x128xf32>
    %46 = vector.extract_strided_slice %9 {offsets = [0, 7, 0], sizes = [2, 1, 128], strides = [1, 1, 1]} : vector<2x8x128xf32> to vector<2x1x128xf32>
    %47 = vector.shape_cast %46 : vector<2x1x128xf32> to vector<2x128xf32>
    %cst_18 = arith.constant dense<0.000000e+00> : vector<2x128xf32>
    %48 = tpu.matmul %45, %0, %cst_18 {dimension_numbers = #tpu.dot_dimension_numbers<[1], [0], [0], [1], [0, 0, 1, 1], [], []>} : vector<2x128xf32>, vector<128x128xbf16>, vector<2x128xf32> -> vector<2x128xf32>
    %49 = arith.addf %47, %48 : vector<2x128xf32>
    %50 = math.tanh %49 : vector<2x128xf32>
    %c0_19 = arith.constant 0 : index
    %c0_20 = arith.constant 0 : index
    %51 = vector.load %arg5[%c0_19, %c0_20] : memref<128x128xbf16, #tpu.memory_space<vmem>>, vector<128x128xbf16>
    %cst_21 = arith.constant dense<0.000000e+00> : vector<2x128xf32>
    %52 = tpu.matmul %50, %51, %cst_21 {dimension_numbers = #tpu.dot_dimension_numbers<[1], [0], [0], [1], [0, 0, 1, 1], [], []>} : vector<2x128xf32>, vector<128x128xbf16>, vector<2x128xf32> -> vector<2x128xf32>
    %c0_22 = arith.constant 0 : index
    %c0_23 = arith.constant 0 : index
    %53 = vector.load %arg6[%c0_22, %c0_23] : memref<1x128xf32, #tpu.memory_space<vmem>>, vector<1x128xf32>
    %54 = vector.broadcast %53 : vector<1x128xf32> to vector<2x128xf32>
    %55 = arith.addf %52, %54 : vector<2x128xf32>
    %56 = arith.negf %55 : vector<2x128xf32>
    %57 = math.exp %56 : vector<2x128xf32>
    %cst_24 = arith.constant 1.000000e+00 : f32
    %58 = vector.broadcast %cst_24 : f32 to vector<2x128xf32>
    %59 = arith.addf %58, %57 : vector<2x128xf32>
    %60 = arith.divf %58, %59 : vector<2x128xf32>
    %c0_25 = arith.constant 0 : index
    %c0_26 = arith.constant 0 : index
    %61 = vector.load %arg7[%c0_25, %c0_26] : memref<128x1024xbf16, #tpu.memory_space<vmem>>, vector<128x1024xbf16>
    %cst_27 = arith.constant dense<0.000000e+00> : vector<2x1024xf32>
    %62 = tpu.matmul %60, %61, %cst_27 {dimension_numbers = #tpu.dot_dimension_numbers<[1], [0], [0], [1], [0, 0, 1, 1], [], []>} : vector<2x128xf32>, vector<128x1024xbf16>, vector<2x1024xf32> -> vector<2x1024xf32>
    %c0_28 = arith.constant 0 : index
    %c0_29 = arith.constant 0 : index
    %63 = vector.load %arg8[%c0_28, %c0_29] : memref<1x1024xf32, #tpu.memory_space<vmem>>, vector<1x1024xf32>
    %64 = vector.broadcast %63 : vector<1x1024xf32> to vector<2x1024xf32>
    %65 = arith.addf %62, %64 : vector<2x1024xf32>
    %c0_30 = arith.constant 0 : index
    %c0_31 = arith.constant 0 : index
    %66 = vector.load %arg9[%c0_30, %c0_31] : memref<2x1024xf32, #tpu.memory_space<vmem>>, vector<2x1024xf32>
    tpu.vector_store %arg9[%c0_30, %c0_31], %65 {strides = array<i32>} : memref<2x1024xf32, #tpu.memory_space<vmem>>, vector<2x1024xf32>,
    return
  }
}

</mosaic_0001>

<bundles_post_ra>
// kernel: tpu_custom_call.1
= control target key start
LH: loop header
LB: loop body
LE: loop exit
PB: predicated region body
PF: predicated region fallthrough
CT: control target
= control target key end

     0   :  { %14 = vsyncpa [#allocation3], 0  ;;  %s4930_s0 = inlined_call_operand.hbm [shape: f32[16,1000], index: 0, kind: input, shape index: {}]   ;;  %s4931_s1 = inlined_call_operand.hbm [shape: bf16[1000,384], index: 1, kind: input, shape index: {}]   ;;  %s4932_s2 = inlined_call_operand.hbm [shape: bf16[384,128], index: 2, kind: input, shape index: {}]   ;;  %s4933_s3 = inlined_call_operand.hbm [shape: bf16[128,128], index: 3, kind: input, shape index: {}]   ;;  %s4934_s4 = inlined_call_operand.vmem [shape: f32[1,128], index: 4, kind: input, shape index: {}]   ;;  %s4935_s5 = inlined_call_operand.hbm [shape: bf16[128,128], index: 5, kind: input, shape index: {}]   ;;  %s4936_s6 = inlined_call_operand.vmem [shape: f32[1,128], index: 6, kind: input, shape index: {}]   ;;  %s4937_s7 = inlined_call_operand.hbm [shape: bf16[128,1024], index: 7, kind: input, shape index: {}]   ;;  %s4938_s8 = inlined_call_operand.vmem [shape: f32[1,1024], index: 8, kind: input, shape index: {}]   ;;  %s4939_s9 = inlined_call_operand.hbm [shape: f32[2,1024], index: 9, kind: output, shape index: {}]  }
   0x1   :  { %15 = vsyncpa [#allocation6], 0 }
   0x2   :  { %16 = vsyncpa [#allocation9], 0 }
   0x3   :  { %17 = vsyncpa [#allocation12], 0 }
   0x4   :  { %18 = vsyncpa [#allocation4], 0  ;;  %s4473_s30 = smov [#allocation5]   ;;  %s4309_s13 = scalar_lea.hbm %s4931_s1, 24000 }
   0x5   :  { %s36_s10 = sshll.u32 %s4473_s30, 4  ;;  %p4310_p0 = scmp.ne.s32.totalorder %s4931_s1, %s4309_s13  ;;  %s37_s10 = int_to_ptr.vmem [resolvable:$true] %s36_s10 }
   0x6   :  { %p4313_p1 = scmp.lt.u32.totalorder %s4309_s13, %s4931_s1 }
   0x8   :  { %p4315_p2 = pnand %p4313_p1, %p4310_p0 }
   0xa   :  { %4318 = shalt.err (!%p4315_p2)
}
   0xb   :  { %s4319_s18 = scalar_lea.vmem %s37_s10, 24000  ;;  %p4324_p4 = scmp.lt.s32.totalorder %s37_s10, %s37_s10 }
   0xc   :  { %p4320_p3 = scmp.ne.s32.totalorder %s37_s10, %s4319_s18  ;;  %p4325_p5 = scmp.lt.s32.totalorder %s4319_s18, %s4319_s18 }
   0xe   :  { %p4326_p6 = por %p4325_p5, %p4324_p4 }
  0x10   :  { %p4327_p7 = pnand %p4326_p6, %p4320_p3 }
  0x12   :  { %4330 = shalt.err (!%p4327_p7)
}
  0x13   :  { %s4474_s19 = smov 192   ;;  %s4475_s20 = smov 12  }
  0x14   :  { %42 = dma.hbm_to_vmem [thread:$0]  %s4931_s1, 24000, %s37_s10, [#allocation6], %s4474_s19, %s4474_s19, %s4475_s20  }
  0x15   :  { %s4476_s23 = smov [#allocation8]   ;;  %s4477_s25 = smov [#allocation2]  }
  0x16   :  { %s60_s24 = sshll.u32 %s4476_s23, 4  ;;  %s24_s26 = sshll.u32 %s4477_s25, 4  ;;  %s61_s24 = int_to_ptr.vmem [resolvable:$true] %s60_s24  ;;  %s25_s26 = int_to_ptr.vmem [resolvable:$true] %s24_s26 }
  0x17   :  { %s4331_s29 = scalar_lea.hbm %s4933_s3, 1024 }
  0x18   :  { %p4332_p8 = scmp.ne.s32.totalorder %s4933_s3, %s4331_s29  ;;  %p4335_p9 = scmp.lt.u32.totalorder %s4331_s29, %s4933_s3 }
  0x1a   :  { %p4337_p10 = pnand %p4335_p9, %p4332_p8 }
  0x1c   :  { %4340 = shalt.err (!%p4337_p10)
}
  0x1d   :  { %s4341_s1 = scalar_lea.vmem %s61_s24, 1024  ;;  %p4346_p12 = scmp.lt.s32.totalorder %s61_s24, %s61_s24 }
  0x1e   :  { %p4342_p11 = scmp.ne.s32.totalorder %s61_s24, %s4341_s1  ;;  %p4347_p13 = scmp.lt.s32.totalorder %s4341_s1, %s4341_s1 }
  0x20   :  { %p4348_p0 = por %p4347_p13, %p4346_p12 }
  0x22   :  { %p4349_p1 = pnand %p4348_p0, %p4342_p11 }
  0x24   :  { %4352 = shalt.err (!%p4349_p1)
}
  0x25   :  { %s4478_s10 = smov 64   ;;  %s4479_s14 = smov 4  }
  0x26   :  { %66 = dma.hbm_to_vmem [thread:$0]  %s4933_s3, 1024, %s61_s24, [#allocation9], %s4478_s10, %s4478_s10, %s4479_s14  }
  0x27   :  { %s4353_s19 = scalar_lea.hbm %s4930_s0, 2048 }
  0x28   :  { %p4354_p2 = scmp.ne.s32.totalorder %s4930_s0, %s4353_s19  ;;  %p4357_p3 = scmp.lt.u32.totalorder %s4353_s19, %s4930_s0 }
  0x2a   :  { %p4359_p4 = pnand %p4357_p3, %p4354_p2 }
  0x2c   :  { %4362 = shalt.err (!%p4359_p4)
}
  0x2d   :  { %s4363_s25 = scalar_lea.vmem %s25_s26, 2048  ;;  %p4368_p6 = scmp.lt.s32.totalorder %s25_s26, %s25_s26 }
  0x2e   :  { %p4364_p5 = scmp.ne.s32.totalorder %s25_s26, %s4363_s25  ;;  %p4369_p7 = scmp.lt.s32.totalorder %s4363_s25, %s4363_s25 }
  0x30   :  { %p4370_p8 = por %p4369_p7, %p4368_p6 }
  0x32   :  { %p4371_p9 = pnand %p4370_p8, %p4364_p5 }
  0x34   :  { %4374 = shalt.err (!%p4371_p9)
}
  0x35   :  { %s4480_s3 = smov 1024   ;;  %s4481_s28 = smov [#allocation7]  }
  0x36   :  { %30 = dma.hbm_to_vmem [thread:$0]  %s4930_s0, 2048, %s25_s26, [#allocation3], %s4480_s3, %s4480_s3, %s4478_s10  }
  0x37   :  { %s48_s29 = sshll.u32 %s4481_s28, 4  ;;  %s4482_s30 = smov [#allocation10]   ;;  %s49_s29 = int_to_ptr.vmem [resolvable:$true] %s48_s29 }
  0x38   :  { %s74_s11 = sshll.u32 %s4482_s30, 4  ;;  %s4375_s1 = scalar_lea.hbm %s4932_s2, 3072  ;;  %s4581_s11 = int_to_ptr.vmem [resolvable:$true] %s74_s11 }
  0x39   :  { %p4376_p10 = scmp.ne.s32.totalorder %s4932_s2, %s4375_s1  ;;  %p4379_p11 = scmp.lt.u32.totalorder %s4375_s1, %s4932_s2 }
  0x3b   :  { %p4381_p12 = pnand %p4379_p11, %p4376_p10 }
  0x3d   :  { %4384 = shalt.err (!%p4381_p12)
}
  0x3e   :  { %s4385_s0 = scalar_lea.vmem %s49_s29, 3072  ;;  %p4390_p0 = scmp.lt.s32.totalorder %s49_s29, %s49_s29 }
  0x3f   :  { %p4386_p13 = scmp.ne.s32.totalorder %s49_s29, %s4385_s0  ;;  %p4391_p1 = scmp.lt.s32.totalorder %s4385_s0, %s4385_s0 }
  0x41   :  { %p4392_p2 = por %p4391_p1, %p4390_p0 }
  0x43   :  { %p4393_p3 = pnand %p4392_p2, %p4386_p13 }
  0x45   :  { %4396 = shalt.err (!%p4393_p3)
}
  0x46   :  { %54 = dma.hbm_to_vmem [thread:$0]  %s4932_s2, 3072, %s49_s29, [#allocation6], %s4478_s10, %s4478_s10, %s4479_s14  }
  0x47   :  { %s4397_s22 = scalar_lea.hbm %s4935_s5, 1024 }
  0x48   :  { %p4398_p4 = scmp.ne.s32.totalorder %s4935_s5, %s4397_s22  ;;  %p4401_p5 = scmp.lt.u32.totalorder %s4397_s22, %s4935_s5 }
  0x4a   :  { %p4403_p6 = pnand %p4401_p5, %p4398_p4 }
  0x4c   :  { %4406 = shalt.err (!%p4403_p6)
}
  0x4d   :  { %s4407_s27 = scalar_lea.vmem %s4581_s11, 1024  ;;  %p4412_p8 = scmp.lt.s32.totalorder %s4581_s11, %s4581_s11 }
  0x4e   :  { %p4408_p7 = scmp.ne.s32.totalorder %s4581_s11, %s4407_s27  ;;  %p4413_p9 = scmp.lt.s32.totalorder %s4407_s27, %s4407_s27 }
  0x50   :  { %p4414_p10 = por %p4413_p9, %p4412_p8 }
  0x52   :  { %p4415_p11 = pnand %p4414_p10, %p4408_p7 }
  0x54   :  { %4418 = shalt.err (!%p4415_p11)
}
  0x55   :  { %80 = dma.hbm_to_vmem [thread:$0]  %s4935_s5, 1024, %s4581_s11, [#allocation9], %s4478_s10, %s4478_s10, %s4479_s14  }
  0x56   :  { %s4483_s29 = smov [#allocation11]   ;;  %s4419_s1 = scalar_lea.hbm %s4937_s7, 8192 }
  0x57   :  { %s88_s30 = sshll.u32 %s4483_s29, 4  ;;  %p4420_p12 = scmp.ne.s32.totalorder %s4937_s7, %s4419_s1  ;;  %s89_s30 = int_to_ptr.vmem [resolvable:$true] %s88_s30 }
  0x58   :  { %p4423_p13 = scmp.lt.u32.totalorder %s4419_s1, %s4937_s7 }
  0x5a   :  { %p4425_p0 = pnand %p4423_p13, %p4420_p12 }
  0x5c   :  { %4428 = shalt.err (!%p4425_p0)
}
  0x5d   :  { %s4429_s0 = scalar_lea.vmem %s89_s30, 8192  ;;  %p4434_p2 = scmp.lt.s32.totalorder %s89_s30, %s89_s30 }
  0x5e   :  { %p4430_p1 = scmp.ne.s32.totalorder %s89_s30, %s4429_s0  ;;  %p4435_p3 = scmp.lt.s32.totalorder %s4429_s0, %s4429_s0 }
  0x60   :  { %p4436_p4 = por %p4435_p3, %p4434_p2 }
  0x62   :  { %p4437_p5 = pnand %p4436_p4, %p4430_p1 }
  0x64   :  { %4440 = shalt.err (!%p4437_p5)
}
  0x65   :  { %s4484_s5 = smov 512   ;;  %s4485_s10 = smov 32  }
  0x66   :  { %94 = dma.hbm_to_vmem [thread:$0]  %s4937_s7, 8192, %s89_s30, [#allocation12], %s4484_s5, %s4484_s5, %s4485_s10  }
  0x67   :  { %4463 = dma.done.wait [#allocation3], 2048  }
  0x68   :  { %4464 = vsyncadd [#allocation3], 4294965248 }
  0x69   :  { %4465 = dma.done.wait [#allocation6], 27072  }
  0x6a   :  { %4466 = vsyncadd [#allocation6], 4294940224 }
  0x6b   :  { %4467 = dma.done.wait [#allocation9], 2048  }
  0x6c   :  { %4468 = vsyncadd [#allocation9], 4294965248 }
  0x6d   :  { %4469 = dma.done.wait [#allocation12], 8192  }
  0x6e   :  { %4470 = vsyncadd [#allocation12], 4294959104  ;;  %v3982_v0 = vld [vmem:[#allocation5 + $0x4] ss:$12 sps:$4 sm:$0xff]   ;;  %v3984_v1 = vld [vmem:[#allocation5] ss:$12 sps:$4 sm:$0xff]  }
  0x6f   :  { %1415 = vmatprep.subr.bf16.mxu0 %v3982_v0  ;;  %v3985_v2 = vld [vmem:[#allocation5 + $0x1c] ss:$12 sps:$4 sm:$0xff]   ;;  %v3987_v3 = vld [vmem:[#allocation5 + $0x18] ss:$12 sps:$4 sm:$0xff]   ;;  %v3989_v5 = vld [vmem:[#allocation5 + $0x34] ss:$12 sps:$4 sm:$0xff]  }
  0x70   :  { %1416 = vmatpush1.bf16.msra.mxu0 %v3984_v1  ;;  %v3988_v4 = vld [vmem:[#allocation5 + $0xc8] ss:$12 sps:$4 sm:$0xff]   ;;  %v3992_v7 = vld [vmem:[#allocation5 + $0x30] ss:$12 sps:$4 sm:$0xff]   ;;  %v3993_v8 = vld [vmem:[#allocation5 + $0xe0] ss:$12 sps:$4 sm:$0xff]  }
  0x71   :  { %1417 = vmatprep.subr.bf16.mxu0 %v3985_v2  ;;  %3583 = vmatprep.subr.bf16.mxu1 %v3988_v4  ;;  %v3991_v6 = vld [vmem:[#allocation5 + $0x8] ss:$12 sps:$4 sm:$0xff]   ;;  %v3994_v9 = vld [vmem:[#allocation5 + $0x4c] ss:$12 sps:$4 sm:$0xff]   ;;  %v3999_v13 = vld [vmem:[#allocation5 + $0x64] ss:$12 sps:$4 sm:$0xff]  }
  0x72   :  { %3584 = vmatpush3.bf16.msra.mxu1 %v3991_v6  ;;  %v3996_v10 = vld [vmem:[#allocation5 + $0x20] ss:$12 sps:$4 sm:$0xff]   ;;  %v3998_v11 = vld [vmem:[#allocation5 + $0xf8] ss:$12 sps:$4 sm:$0xff]   ;;  %v3997_v12 = vld [vmem:[#allocation5 + $0x48] ss:$12 sps:$4 sm:$0xff]  }
  0x73   :  { %3585 = vmatprep.subr.bf16.mxu1 %v3993_v8  ;;  %v4001_v14 = vld [vmem:[#allocation5 + $0x38] ss:$12 sps:$4 sm:$0xff]   ;;  %v4003_v15 = vld [vmem:[#allocation5 + $0x110] ss:$12 sps:$4 sm:$0xff]   ;;  %v4002_v16 = vld [vmem:[#allocation5 + $0x60] ss:$12 sps:$4 sm:$0xff]  }
  0x74   :  { %1418 = vmatpush1.bf16.msra.mxu0 %v3987_v3  ;;  %v4004_v17 = vld [vmem:[#allocation5 + $0x7c] ss:$12 sps:$4 sm:$0xff]   ;;  %v4007_v20 = vld [vmem:[#allocation5 + $0x78] ss:$12 sps:$4 sm:$0xff]   ;;  %v4009_v21 = vld [vmem:[#allocation5 + $0x94] ss:$12 sps:$4 sm:$0xff]  }
  0x75   :  { %1419 = vmatprep.subr.bf16.mxu0 %v3989_v5  ;;  %v4006_v18 = vld [vmem:[#allocation5 + $0x50] ss:$12 sps:$4 sm:$0xff]   ;;  %v4008_v19 = vld [vmem:[#allocation5 + $0x128] ss:$12 sps:$4 sm:$0xff]   ;;  %v4013_v23 = vld [vmem:[#allocation5 + $0x140] ss:$12 sps:$4 sm:$0xff]  }
  0x76   :  { %3586 = vmatpush3.bf16.msra.mxu1 %v3996_v10  ;;  %v4011_v22 = vld [vmem:[#allocation5 + $0x68] ss:$12 sps:$4 sm:$0xff]   ;;  %v4012_v24 = vld [vmem:[#allocation5 + $0x90] ss:$12 sps:$4 sm:$0xff]   ;;  %v4014_v25 = vld [vmem:[#allocation5 + $0xac] ss:$12 sps:$4 sm:$0xff]  }
  0x77   :  { %3587 = vmatprep.subr.bf16.mxu1 %v3998_v11  ;;  %v4016_v26 = vld [vmem:[#allocation5 + $0x80] ss:$12 sps:$4 sm:$0xff]   ;;  %v4018_v27 = vld [vmem:[#allocation5 + $0x158] ss:$12 sps:$4 sm:$0xff]   ;;  %v4017_v28 = vld [vmem:[#allocation5 + $0xa8] ss:$12 sps:$4 sm:$0xff]  }
  0x78   :  { %1420 = vmatpush1.bf16.msra.mxu0 %v3992_v7  ;;  %v4019_v29 = vld [vmem:[#allocation5 + $0xc4] ss:$12 sps:$4 sm:$0xff]   ;;  %v133_v32 = vld [vmem:[#allocation2 + $0x8] sm:$0xff]  ;;  %v4029_v40 = vld [vmem:[#allocation5 + $0xf4] ss:$12 sps:$4 sm:$0xff]   ;;  %vm1398_vm0 = vcmask 850944  }
  0x79   :  { %1421 = vmatprep.subr.bf16.mxu0 %v3994_v9  ;;  %v4021_v30 = vld [vmem:[#allocation5 + $0x98] ss:$12 sps:$4 sm:$0xff]   ;;  %v4023_v31 = vld [vmem:[#allocation5 + $0x170] ss:$12 sps:$4 sm:$0xff]   ;;  %v4022_v33 = vld [vmem:[#allocation5 + $0xc0] ss:$12 sps:$4 sm:$0xff]   ;;  %1627 = vmatprep.mubr.f32.mxu1 %v133_v32 }
  0x7a   :  { %3588 = vmatpush3.bf16.msra.mxu1 %v4001_v14  ;;  %1447 = vmatprep.mubr.f32.mxu0 %v133_v32  ;;  %v4024_v34 = vld [vmem:[#allocation5 + $0xdc] ss:$12 sps:$4 sm:$0xff]   ;;  %v4027_v37 = vld [vmem:[#allocation5 + $0xd8] ss:$12 sps:$4 sm:$0xff]   ;;  %v4033_v41 = vld [vmem:[#allocation5 + $0x260] ss:$12 sps:$4 sm:$0xff]  }
  0x7b   :  { %3589 = vmatprep.subr.bf16.mxu1 %v4003_v15  ;;  %v4026_v35 = vld [vmem:[#allocation5 + $0xb0] ss:$12 sps:$4 sm:$0xff]   ;;  %v4028_v36 = vld [vmem:[#allocation5 + $0x248] ss:$12 sps:$4 sm:$0xff]   ;;  %v4630_v38 = vld [vmem:[#allocation2] sm:$0xff]  ;;  %vm1405_vm1 = vcmask 1043456  }
  0x7c   :  { %1422 = vmatpush1.bf16.msra.mxu0 %v3997_v12  ;;  %v4031_v39 = vld [vmem:[#allocation5 + $0x188] ss:$12 sps:$4 sm:$0xff]   ;;  %v4032_v42 = vld [vmem:[#allocation5 + $0xf0] ss:$12 sps:$4 sm:$0xff]   ;;  %v4034_v43 = vld [vmem:[#allocation5 + $0x10c] ss:$12 sps:$4 sm:$0xff]  }
  0x7d   :  { %1423 = vmatprep.subr.bf16.mxu0 %v3999_v13  ;;  %v4036_v44 = vld [vmem:[#allocation5 + $0x1a0] ss:$12 sps:$4 sm:$0xff]   ;;  %v4038_v45 = vld [vmem:[#allocation5 + $0x278] ss:$12 sps:$4 sm:$0xff]   ;;  %v4037_v46 = vld [vmem:[#allocation5 + $0x108] ss:$12 sps:$4 sm:$0xff]  }
  0x7e   :  { %3590 = vmatpush3.bf16.msra.mxu1 %v4006_v18  ;;  %v4039_v47 = vld [vmem:[#allocation5 + $0x124] ss:$12 sps:$4 sm:$0xff]   ;;  %v4042_v50 = vld [vmem:[#allocation5 + $0x120] ss:$12 sps:$4 sm:$0xff]   ;;  %v4044_v51 = vld [vmem:[#allocation5 + $0x13c] ss:$12 sps:$4 sm:$0xff]  }
  0x7f   :  { %3591 = vmatprep.subr.bf16.mxu1 %v4008_v19  ;;  %v4041_v48 = vld [vmem:[#allocation5 + $0x1b8] ss:$12 sps:$4 sm:$0xff]   ;;  %v4043_v49 = vld [vmem:[#allocation5 + $0x290] ss:$12 sps:$4 sm:$0xff]   ;;  %v4048_v53 = vld [vmem:[#allocation5 + $0x2a8] ss:$12 sps:$4 sm:$0xff]  }
  0x80   :  { %1424 = vmatpush1.bf16.msra.mxu0 %v4002_v16  ;;  %v4046_v52 = vld [vmem:[#allocation5 + $0x1d0] ss:$12 sps:$4 sm:$0xff]   ;;  %v4047_v54 = vld [vmem:[#allocation5 + $0x138] ss:$12 sps:$4 sm:$0xff]   ;;  %v4049_v55 = vld [vmem:[#allocation5 + $0x154] ss:$12 sps:$4 sm:$0xff]  }
  0x81   :  { %1425 = vmatprep.subr.bf16.mxu0 %v4004_v17  ;;  %v4051_v56 = vld [vmem:[#allocation5 + $0x1e8] ss:$12 sps:$4 sm:$0xff]   ;;  %v4053_v57 = vld [vmem:[#allocation5 + $0x2c0] ss:$12 sps:$4 sm:$0xff]   ;;  %v4052_v58 = vld [vmem:[#allocation5 + $0x150] ss:$12 sps:$4 sm:$0xff]  }
  0x82   :  { %3592 = vmatpush3.bf16.msra.mxu1 %v4011_v22  ;;  %v141_v59 = vld [vmem:[#allocation2 + $0x48] sm:$0xff]  ;;  %v4058_v62 = vld [vmem:[#allocation5 + $0x2d8] ss:$12 sps:$4 sm:$0xff]   ;;  %v4063_v4 = vld [vmem:[#allocation5 + $0x2f0] ss:$12 sps:$4 sm:$0xff]   ;;  %vm4488_vm2 = vmmov 0  }
  0x83   :  { %3593 = vmatprep.subr.bf16.mxu1 %v4013_v23  ;;  %v4054_v60 = vld [vmem:[#allocation5 + $0x16c] ss:$12 sps:$4 sm:$0xff]   ;;  %v140_v63 = vld [vmem:[#allocation2 + $0x40] sm:$0xff]  ;;  %v4057_v1 = vld [vmem:[#allocation5 + $0x168] ss:$12 sps:$4 sm:$0xff]   ;;  %vm2149_vm3 = vcmask 1041409  }
  0x84   :  { %1426 = vmatpush1.bf16.msra.mxu0 %v4007_v20  ;;  %v4056_v61 = vld [vmem:[#allocation5 + $0x200] ss:$12 sps:$4 sm:$0xff]   ;;  %v135_v0 = vld [vmem:[#allocation2 + $0x18] sm:$0xff]  ;;  %v4061_v2 = vld [vmem:[#allocation5 + $0x184] ss:$12 sps:$4 sm:$0xff]  }
  0x85   :  { %1427 = vmatprep.subr.bf16.mxu0 %v4009_v21  ;;  %v4062_v3 = vld [vmem:[#allocation5 + $0x218] ss:$12 sps:$4 sm:$0xff]   ;;  %v4059_v5 = vld [vmem:[#allocation5 + $0x180] ss:$12 sps:$4 sm:$0xff]   ;;  %v4066_v6 = vld [vmem:[#allocation5 + $0x19c] ss:$12 sps:$4 sm:$0xff]  }
  0x86   :  { %3594 = vmatpush3.bf16.msra.mxu1 %v4016_v26  ;;  %v4067_v7 = vld [vmem:[#allocation5 + $0x230] ss:$12 sps:$4 sm:$0xff]   ;;  %v4068_v8 = vld [vmem:[#allocation5 + $0x3c8] ss:$12 sps:$4 sm:$0xff]   ;;  %v4064_v9 = vld [vmem:[#allocation5 + $0x198] ss:$12 sps:$4 sm:$0xff]  }
  0x87   :  { %3595 = vmatprep.subr.bf16.mxu1 %v4018_v27  ;;  %v4071_v10 = vld [vmem:[#allocation5 + $0x1b4] ss:$12 sps:$4 sm:$0xff]   ;;  %v4069_v14 = vld [vmem:[#allocation5 + $0x1b0] ss:$12 sps:$4 sm:$0xff]   ;;  %v4076_v15 = vld [vmem:[#allocation5 + $0x1cc] ss:$12 sps:$4 sm:$0xff]  }
  0x88   :  { %1428 = vmatpush1.bf16.msra.mxu0 %v4012_v24  ;;  %v4634_v11 = vld [vmem:[#allocation2 + $0x10] sm:$0xff]  ;;  %v4073_v13 = vld [vmem:[#allocation5 + $0x3e0] ss:$12 sps:$4 sm:$0xff]   ;;  %v4078_v17 = vld [vmem:[#allocation5 + $0x3f8] ss:$12 sps:$4 sm:$0xff]  }
  0x89   :  { %1429 = vmatprep.subr.bf16.mxu0 %v4014_v25  ;;  %v4072_v12 = vld [vmem:[#allocation5 + $0x308] ss:$12 sps:$4 sm:$0xff]   ;;  %v4077_v16 = vld [vmem:[#allocation5 + $0x320] ss:$12 sps:$4 sm:$0xff]   ;;  %v4082_v19 = vld [vmem:[#allocation5 + $0x338] ss:$12 sps:$4 sm:$0xff]  }
  0x8a   :  { %3596 = vmatpush3.bf16.msra.mxu1 %v4021_v30  ;;  %v4074_v18 = vld [vmem:[#allocation5 + $0x1c8] ss:$12 sps:$4 sm:$0xff]   ;;  %v4081_v20 = vld [vmem:[#allocation5 + $0x1e4] ss:$12 sps:$4 sm:$0xff]   ;;  %v4079_v22 = vld [vmem:[#allocation5 + $0x1e0] ss:$12 sps:$4 sm:$0xff]  }
  0x8b   :  { %3597 = vmatprep.subr.bf16.mxu1 %v4023_v31  ;;  %v4083_v21 = vld [vmem:[#allocation5 + $0x410] ss:$12 sps:$4 sm:$0xff]   ;;  %v4088_v25 = vld [vmem:[#allocation5 + $0x428] ss:$12 sps:$4 sm:$0xff]   ;;  %v4084_v26 = vld [vmem:[#allocation5 + $0x1f8] ss:$12 sps:$4 sm:$0xff]  }
  0x8c   :  { %1430 = vmatpush1.bf16.msra.mxu0 %v4017_v28  ;;  %v4086_v23 = vld [vmem:[#allocation5 + $0x1fc] ss:$12 sps:$4 sm:$0xff]   ;;  %v4091_v28 = vld [vmem:[#allocation5 + $0x214] ss:$12 sps:$4 sm:$0xff]  }
  0x8d   :  { %1431 = vmatprep.subr.bf16.mxu0 %v4019_v29  ;;  %v4087_v24 = vld [vmem:[#allocation5 + $0x350] ss:$12 sps:$4 sm:$0xff]   ;;  %v4092_v29 = vld [vmem:[#allocation5 + $0x368] ss:$12 sps:$4 sm:$0xff]   ;;  %v4093_v30 = vld [vmem:[#allocation5 + $0x440] ss:$12 sps:$4 sm:$0xff]  }
  0x8e   :  { %3598 = vmatpush3.bf16.msra.mxu1 %v4026_v35  ;;  %v4637_v27 = vld [vmem:[#allocation2 + $0x58] sm:$0xff]  ;;  %v4640_v31 = vld [vmem:[#allocation2 + $0x50] sm:$0xff]  ;;  %v4643_v32 = vld [vmem:[#allocation2 + $0x28] sm:$0xff] }
  0x8f   :  { %3605 = vmatprep.subr.bf16.mxu1 %v4028_v36  ;;  %v4097_v35 = vld [vmem:[#allocation5 + $0x380] ss:$12 sps:$4 sm:$0xff]   ;;  %v4098_v36 = vld [vmem:[#allocation5 + $0x458] ss:$12 sps:$4 sm:$0xff]  }
  0x90   :  { %1432 = vmatpush1.bf16.msra.mxu0 %v4022_v33  ;;  %v4089_v33 = vld [vmem:[#allocation5 + $0x210] ss:$12 sps:$4 sm:$0xff]  }
  0x91   :  { %1433 = vmatprep.subr.bf16.mxu0 %v4024_v34  ;;  %1628 = vmatmul.mubr.f32.vlgmr.msra.gmra.mrb[0].mxu1 %v4630_v38  ;;  %v4096_v34 = vld [vmem:[#allocation5 + $0x22c] ss:$12 sps:$4 sm:$0xff]  }
  0x92   :  { %3606 = vmatpush3.bf16.msra.mxu1 %v4031_v39  ;;  %1632 = vmatprep.mubr.f32.mxu1 %v141_v59  ;;  %v4102_v39 = vld [vmem:[#allocation5 + $0x398] ss:$12 sps:$4 sm:$0xff]  }
  0x93   :  { %3607 = vmatprep.subr.bf16.mxu1 %v4033_v41  ;;  %v4099_v41 = vld [vmem:[#allocation5 + $0x240] ss:$12 sps:$4 sm:$0xff]  }
  0x94   :  { %1434 = vmatpush1.bf16.msra.mxu0 %v4027_v37  ;;  %v4094_v37 = vld [vmem:[#allocation5 + $0x228] ss:$12 sps:$4 sm:$0xff]  }
  0x95   :  { %1435 = vmatprep.subr.bf16.mxu0 %v4029_v40  ;;  %1633 = vmatmul.mubr.f32.gmra.mrb[2].mxu1 %v140_v63  ;;  %v4103_v40 = vld [vmem:[#allocation5 + $0x470] ss:$12 sps:$4 sm:$0xff]  }
  0x96   :  { %3608 = vmatpush3.bf16.msra.mxu1 %v4036_v44  ;;  %1670 = vmatprep.mubr.f32.mxu1 %v135_v0  ;;  %v4104_v44 = vld [vmem:[#allocation5 + $0x258] ss:$12 sps:$4 sm:$0xff]  }
  0x97   :  { %3609 = vmatprep.subr.bf16.mxu1 %v4038_v45  ;;  %v4646_v45 = vld [vmem:[#allocation2 + $0x20] sm:$0xff] }
  0x98   :  { %1436 = vmatpush1.bf16.msra.mxu0 %v4032_v42  ;;  %v4107_v42 = vld [vmem:[#allocation5 + $0x3b0] ss:$12 sps:$4 sm:$0xff]  }
  0x99   :  { %1437 = vmatprep.subr.bf16.mxu0 %v4034_v43  ;;  %v4106_v43 = vld [vmem:[#allocation5 + $0x25c] ss:$12 sps:$4 sm:$0xff]  }
  0x9a   :  { %3610 = vmatpush3.bf16.msra.mxu1 %v4041_v48  ;;  %v4110_v48 = vld [vmem:[#allocation5 + $0x274] ss:$12 sps:$4 sm:$0xff]  }
  0x9b   :  { %3611 = vmatprep.subr.bf16.mxu1 %v4043_v49  ;;  %v4108_v49 = vld [vmem:[#allocation5 + $0x270] ss:$12 sps:$4 sm:$0xff]  }
  0x9c   :  { %1438 = vmatpush1.bf16.msra.mxu0 %v4037_v46  ;;  %v4111_v46 = vld [vmem:[#allocation5 + $0x488] ss:$12 sps:$4 sm:$0xff]  }
  0x9d   :  { %1439 = vmatprep.subr.bf16.mxu0 %v4039_v47  ;;  %v4486_v47 = vmov 0  }
  0x9e   :  { %3612 = vmatpush3.bf16.msra.mxu1 %v4046_v52  ;;  %v4112_v52 = vld [vmem:[#allocation5 + $0x288] ss:$12 sps:$4 sm:$0xff]  }
  0x9f   :  { %3613 = vmatprep.subr.bf16.mxu1 %v4048_v53  ;;  %v4119_v53 = vld [vmem:[#allocation5 + $0x4b8] ss:$12 sps:$4 sm:$0xff]  }
  0xa0   :  { %1440 = vmatpush1.bf16.msra.mxu0 %v4042_v50  ;;  %v4115_v50 = vld [vmem:[#allocation5 + $0x4a0] ss:$12 sps:$4 sm:$0xff]  }
  0xa1   :  { %1441 = vmatprep.subr.bf16.mxu0 %v4044_v51  ;;  %v4114_v51 = vld [vmem:[#allocation5 + $0x28c] ss:$12 sps:$4 sm:$0xff]  }
  0xa2   :  { %3614 = vmatpush3.bf16.msra.mxu1 %v4051_v56  ;;  %v4123_v56 = vld [vmem:[#allocation5 + $0x4d0] ss:$12 sps:$4 sm:$0xff]  }
  0xa3   :  { %3615 = vmatprep.subr.bf16.mxu1 %v4053_v57  ;;  %v4122_v57 = vld [vmem:[#allocation5 + $0x2bc] ss:$12 sps:$4 sm:$0xff]  }
  0xa4   :  { %1442 = vmatpush1.bf16.msra.mxu0 %v4047_v54  ;;  %v4118_v54 = vld [vmem:[#allocation5 + $0x2a4] ss:$12 sps:$4 sm:$0xff]  }
  0xa5   :  { %1443 = vmatprep.subr.bf16.mxu0 %v4049_v55  ;;  %v4116_v55 = vld [vmem:[#allocation5 + $0x2a0] ss:$12 sps:$4 sm:$0xff]  }
  0xa6   :  { %3616 = vmatpush3.bf16.msra.mxu1 %v4056_v61  ;;  %v4124_v61 = vld [vmem:[#allocation5 + $0x2d0] ss:$12 sps:$4 sm:$0xff]  }
  0xa7   :  { %3617 = vmatprep.subr.bf16.mxu1 %v4058_v62  ;;  %v4131_v62 = vld [vmem:[#allocation5 + $0x500] ss:$12 sps:$4 sm:$0xff]  }
  0xa8   :  { %1444 = vmatpush1.bf16.msra.mxu0 %v4052_v58  ;;  %v4120_v58 = vld [vmem:[#allocation5 + $0x2b8] ss:$12 sps:$4 sm:$0xff]  }
  0xa9   :  { %1445 = vmatprep.subr.bf16.mxu0 %v4054_v60  ;;  %v4126_v60 = vld [vmem:[#allocation5 + $0x2d4] ss:$12 sps:$4 sm:$0xff]  }
  0xaa   :  { %3618 = vmatpush3.bf16.msra.mxu1 %v4062_v3  ;;  %v4661_v3 = vld [vmem:[#allocation2 + $0x38] sm:$0xff] }
  0xab   :  { %3619 = vmatprep.subr.bf16.mxu1 %v4063_v4  ;;  %v4135_v4 = vld [vmem:[#allocation5 + $0x518] ss:$12 sps:$4 sm:$0xff]  }
  0xac   :  { %1446 = vmatpush1.bf16.msra.mxu0 %v4057_v1  ;;  %v4130_v1 = vld [vmem:[#allocation5 + $0x2ec] ss:$12 sps:$4 sm:$0xff]  }
  0xad   :  { %1460 = vmatprep.subr.bf16.mxu0 %v4061_v2  ;;  %v4128_v2 = vld [vmem:[#allocation5 + $0x2e8] ss:$12 sps:$4 sm:$0xff]  }
  0xae   :  { %3620 = vmatpush3.bf16.msra.mxu1 %v4067_v7  ;;  %v4139_v7 = vld [vmem:[#allocation5 + $0x530] ss:$12 sps:$4 sm:$0xff]  }
  0xaf   :  { %1448 = vmatmul.mubr.f32.vlgmr.msra.gmra.mrb[0].mxu0 %v4630_v38  ;;  %3627 = vmatprep.subr.bf16.mxu1 %v4068_v8  ;;  %v4101_v38 = vld [vmem:[#allocation5 + $0x244] ss:$12 sps:$4 sm:$0xff]   ;;  %v4138_v8 = vld [vmem:[#allocation5 + $0x31c] ss:$12 sps:$4 sm:$0xff]  }
  0xb0   :  { %1461 = vmatpush1.bf16.msra.mxu0 %v4059_v5  ;;  %1453 = vmatprep.mubr.f32.mxu0 %v141_v59  ;;  %v4127_v59 = vld [vmem:[#allocation5 + $0x4e8] ss:$12 sps:$4 sm:$0xff]   ;;  %v4134_v5 = vld [vmem:[#allocation5 + $0x304] ss:$12 sps:$4 sm:$0xff]  }
  0xb1   :  { %1462 = vmatprep.subr.bf16.mxu0 %v4066_v6  ;;  %1671 = vmatmul.mubr.f32.vlgmr.msra.gmra.mrb[4].mxu1 %v4634_v11  ;;  %v4132_v6 = vld [vmem:[#allocation5 + $0x300] ss:$12 sps:$4 sm:$0xff]  }
  0xb2   :  { %3628 = vmatpush3.bf16.msra.mxu1 %v4072_v12  ;;  %1675 = vmatprep.mubr.f32.mxu1 %v4637_v27  ;;  %v4142_v12 = vld [vmem:[#allocation5 + $0x334] ss:$12 sps:$4 sm:$0xff]  }
  0xb3   :  { %1454 = vmatmul.mubr.f32.gmra.mrb[2].mxu0 %v140_v63  ;;  %3629 = vmatprep.subr.bf16.mxu1 %v4073_v13  ;;  %v4654_v63 = vld [vmem:[#allocation2 + $0x68] sm:$0xff]  ;;  %v4140_v13 = vld [vmem:[#allocation5 + $0x330] ss:$12 sps:$4 sm:$0xff]  }
  0xb4   :  { %1463 = vmatpush1.bf16.msra.mxu0 %v4064_v9  ;;  %1492 = vmatprep.mubr.f32.mxu0 %v135_v0  ;;  %v4656_v0 = vld [vmem:[#allocation2 + $0x60] sm:$0xff] }
  0xb5   :  { %1464 = vmatprep.subr.bf16.mxu0 %v4071_v10  ;;  %1676 = vmatmul.mubr.f32.gmra.mrb[6].mxu1 %v4640_v31  ;;  %v4136_v9 = vld [vmem:[#allocation5 + $0x318] ss:$12 sps:$4 sm:$0xff]   ;;  %v4143_v10 = vld [vmem:[#allocation5 + $0x548] ss:$12 sps:$4 sm:$0xff]  }
  0xb6   :  { %3630 = vmatpush3.bf16.msra.mxu1 %v4077_v16  ;;  %1713 = vmatprep.mubr.f32.mxu1 %v4643_v32  ;;  %v4151_v16 = vld [vmem:[#allocation5 + $0x578] ss:$12 sps:$4 sm:$0xff]  }
  0xb7   :  { %3631 = vmatprep.subr.bf16.mxu1 %v4078_v17  ;;  %v4150_v17 = vld [vmem:[#allocation5 + $0x364] ss:$12 sps:$4 sm:$0xff]  }
  0xb8   :  { %1465 = vmatpush1.bf16.msra.mxu0 %v4069_v14  ;;  %v4147_v14 = vld [vmem:[#allocation5 + $0x560] ss:$12 sps:$4 sm:$0xff]  }
  0xb9   :  { %1466 = vmatprep.subr.bf16.mxu0 %v4076_v15  ;;  %v4144_v15 = vld [vmem:[#allocation5 + $0x348] ss:$12 sps:$4 sm:$0xff]  }
  0xba   :  { %3632 = vmatpush3.bf16.msra.mxu1 %v4082_v19  ;;  %v4155_v19 = vld [vmem:[#allocation5 + $0x590] ss:$12 sps:$4 sm:$0xff]  }
  0xbb   :  { %3633 = vmatprep.subr.bf16.mxu1 %v4083_v21  ;;  %v4152_v21 = vld [vmem:[#allocation5 + $0x378] ss:$12 sps:$4 sm:$0xff]  }
  0xbc   :  { %1467 = vmatpush1.bf16.msra.mxu0 %v4074_v18  ;;  %v4148_v18 = vld [vmem:[#allocation5 + $0x360] ss:$12 sps:$4 sm:$0xff]  }
  0xbd   :  { %1468 = vmatprep.subr.bf16.mxu0 %v4081_v20  ;;  %v4154_v20 = vld [vmem:[#allocation5 + $0x37c] ss:$12 sps:$4 sm:$0xff]  }
  0xbe   :  { %3634 = vmatpush3.bf16.msra.mxu1 %v4087_v24  ;;  %v4167_v24 = vld [vmem:[#allocation5 + $0x5d8] ss:$0 sps:$4 sm:$0xff]  }
  0xbf   :  { %3635 = vmatprep.subr.bf16.mxu1 %v4088_v25  ;;  %v4156_v25 = vld [vmem:[#allocation5 + $0x390] ss:$12 sps:$4 sm:$0xff]  }
  0xc0   :  { %1469 = vmatpush1.bf16.msra.mxu0 %v4079_v22  ;;  %v4159_v22 = vld [vmem:[#allocation5 + $0x5a8] ss:$12 sps:$4 sm:$0xff]  }
  0xc1   :  { %1470 = vmatprep.subr.bf16.mxu0 %v4086_v23  ;;  %v4158_v23 = vld [vmem:[#allocation5 + $0x394] ss:$12 sps:$4 sm:$0xff]  }
  0xc2   :  { %3636 = vmatpush3.bf16.msra.mxu1 %v4092_v29  ;;  %v1413_v29 = vsel %vm1405_vm1, %v4167_v24, 0  ;;  %v4237_v24 = vld [vmem:[#allocation7 + $0x50] sm:$0xff]  }
  0xc3   :  { %3637 = vmatprep.subr.bf16.mxu1 %v4093_v30  ;;  %v4166_v30 = vld [vmem:[#allocation5 + $0x3c4] ss:$12 sps:$4 sm:$0xff]  }
  0xc4   :  { %1471 = vmatpush1.bf16.msra.mxu0 %v4084_v26  ;;  %v4162_v26 = vld [vmem:[#allocation5 + $0x3ac] ss:$12 sps:$4 sm:$0xff]  }
  0xc5   :  { %1472 = vmatprep.subr.bf16.mxu0 %v4091_v28  ;;  %v4160_v28 = vld [vmem:[#allocation5 + $0x3a8] ss:$12 sps:$4 sm:$0xff]  }
  0xc6   :  { %3638 = vmatpush3.bf16.msra.mxu1 %v4097_v35  ;;  %v4168_v35 = vld [vmem:[#allocation5 + $0x3d8] ss:$12 sps:$4 sm:$0xff]  }
  0xc7   :  { %3639 = vmatprep.subr.bf16.mxu1 %v4098_v36  ;;  %v4683_v36 = vld [vmem:[#allocation2 + $0x70] sm:$0xff] }
  0xc8   :  { %1473 = vmatpush1.bf16.msra.mxu0 %v4089_v33  ;;  %v4170_v33 = vld [vmem:[#allocation5 + $0x3dc] ss:$12 sps:$4 sm:$0xff]  }
  0xc9   :  { %1474 = vmatprep.subr.bf16.mxu0 %v4096_v34  ;;  %v4681_v34 = vld [vmem:[#allocation2 + $0x78] sm:$0xff] }
  0xca   :  { %3640 = vmatpush3.bf16.msra.mxu1 %v4102_v39  ;;  %v4176_v39 = vld [vmem:[#allocation5 + $0x40c] ss:$12 sps:$4 sm:$0xff]  }
  0xcb   :  { %3641 = vmatprep.subr.bf16.mxu1 %v4103_v40  ;;  %v4174_v40 = vld [vmem:[#allocation5 + $0x408] ss:$12 sps:$4 sm:$0xff]  }
  0xcc   :  { %1475 = vmatpush1.bf16.msra.mxu0 %v4094_v37  ;;  %v4173_v37 = vld [vmem:[#allocation5 + $0x3f4] ss:$12 sps:$4 sm:$0xff]  }
  0xcd   :  { %1476 = vmatprep.subr.bf16.mxu0 %v4101_v38  ;;  %v4171_v38 = vld [vmem:[#allocation5 + $0x3f0] ss:$12 sps:$4 sm:$0xff]  }
  0xce   :  { %3642 = vmatpush3.bf16.msra.mxu1 %v4107_v42  ;;  %v4177_v42 = vld [vmem:[#allocation5 + $0x420] ss:$12 sps:$4 sm:$0xff]  }
  0xcf   :  { %1724 = vmatprep.subr.bf16.mxu1 %v4486_v47 }
  0xd0   :  { %1477 = vmatpush1.bf16.msra.mxu0 %v4099_v41  ;;  %v4179_v41 = vld [vmem:[#allocation5 + $0x424] ss:$12 sps:$4 sm:$0xff]  }
  0xd1   :  { %1478 = vmatprep.subr.bf16.mxu0 %v4106_v43  ;;  %1714 = vmatmul.mubr.f32.vlgmr.msra.gmra.mrb[8].mxu1 %v4646_v45  ;;  %v4182_v43 = vld [vmem:[#allocation5 + $0x43c] ss:$12 sps:$4 sm:$0xff]  }
  0xd2   :  { %1725 = vmatpush1.bf16.msra.mxu1 %v4111_v46  ;;  %1718 = vmatprep.mubr.f32.mxu1 %v4654_v63  ;;  %v4185_v46 = vld [vmem:[#allocation5 + $0x454] ss:$12 sps:$4 sm:$0xff]  }
  0xd3   :  { %1726 = vmatprep.subr.bf16.mxu1 %v4486_v47 }
  0xd4   :  { %1479 = vmatpush1.bf16.msra.mxu0 %v4104_v44  ;;  %v4180_v44 = vld [vmem:[#allocation5 + $0x438] ss:$12 sps:$4 sm:$0xff]  }
  0xd5   :  { %1480 = vmatprep.subr.bf16.mxu0 %v4110_v48  ;;  %1719 = vmatmul.mubr.f32.gmra.mrb[10].mxu1 %v4656_v0  ;;  %v4188_v48 = vld [vmem:[#allocation5 + $0x46c] ss:$12 sps:$4 sm:$0xff]  }
  0xd6   :  { %1727 = vmatpush1.bf16.msra.mxu1 %v4115_v50  ;;  %3474 = vmatprep.mubr.msk.f32.mxu1 %vm1398_vm0, %v4661_v3  ;;  %v4191_v50 = vld [vmem:[#allocation5 + $0x484] ss:$12 sps:$4 sm:$0xff]  }
  0xd7   :  { %1728 = vmatprep.subr.bf16.mxu1 %v4486_v47 }
  0xd8   :  { %1481 = vmatpush1.bf16.msra.mxu0 %v4108_v49  ;;  %v4186_v49 = vld [vmem:[#allocation5 + $0x468] ss:$12 sps:$4 sm:$0xff]  }
  0xd9   :  { %1482 = vmatprep.subr.bf16.mxu0 %v4114_v51  ;;  %v4189_v51 = vld [vmem:[#allocation5 + $0x480] ss:$12 sps:$4 sm:$0xff]  }
  0xda   :  { %1729 = vmatpush1.bf16.msra.mxu1 %v4119_v53  ;;  %v4192_v53 = vld [vmem:[#allocation5 + $0x498] ss:$12 sps:$4 sm:$0xff]  }
  0xdb   :  { %1730 = vmatprep.subr.bf16.mxu1 %v4486_v47 }
  0xdc   :  { %1483 = vmatpush1.bf16.msra.mxu0 %v4112_v52  ;;  %v4194_v52 = vld [vmem:[#allocation5 + $0x49c] ss:$12 sps:$4 sm:$0xff]  }
  0xdd   :  { %1484 = vmatprep.subr.bf16.mxu0 %v4118_v54  ;;  %v4197_v54 = vld [vmem:[#allocation5 + $0x4b4] ss:$12 sps:$4 sm:$0xff]  }
  0xde   :  { %1731 = vmatpush1.bf16.msra.mxu1 %v4123_v56  ;;  %v4200_v56 = vld [vmem:[#allocation5 + $0x4cc] ss:$12 sps:$4 sm:$0xff]  }
  0xdf   :  { %1732 = vmatprep.subr.bf16.mxu1 %v4486_v47 }
  0xe0   :  { %1485 = vmatpush1.bf16.msra.mxu0 %v4116_v55  ;;  %v4195_v55 = vld [vmem:[#allocation5 + $0x4b0] ss:$12 sps:$4 sm:$0xff]  }
  0xe1   :  { %1486 = vmatprep.subr.bf16.mxu0 %v4122_v57  ;;  %v4198_v57 = vld [vmem:[#allocation5 + $0x4c8] ss:$12 sps:$4 sm:$0xff]  }
  0xe2   :  { %1733 = vmatpush1.bf16.msra.mxu1 %v4127_v59  ;;  %v4206_v59 = vld [vmem:[#allocation5 + $0x4fc] ss:$12 sps:$4 sm:$0xff]  }
  0xe3   :  { %1734 = vmatprep.subr.bf16.mxu1 %v4486_v47 }
  0xe4   :  { %1487 = vmatpush1.bf16.msra.mxu0 %v4120_v58  ;;  %v4203_v58 = vld [vmem:[#allocation5 + $0x4e4] ss:$12 sps:$4 sm:$0xff]  }
  0xe5   :  { %1488 = vmatprep.subr.bf16.mxu0 %v4126_v60  ;;  %v4204_v60 = vld [vmem:[#allocation5 + $0x4f8] ss:$12 sps:$4 sm:$0xff]  }
  0xe6   :  { %1735 = vmatpush1.bf16.msra.mxu1 %v4131_v62  ;;  %v4207_v62 = vld [vmem:[#allocation5 + $0x510] ss:$12 sps:$4 sm:$0xff]  }
  0xe7   :  { %1736 = vmatprep.subr.bf16.mxu1 %v4486_v47 }
  0xe8   :  { %1489 = vmatpush1.bf16.msra.mxu0 %v4124_v61  ;;  %v4209_v61 = vld [vmem:[#allocation5 + $0x514] ss:$12 sps:$4 sm:$0xff]  }
  0xe9   :  { %1490 = vmatprep.subr.bf16.mxu0 %v4130_v1  ;;  %v4215_v1 = vld [vmem:[#allocation5 + $0x544] ss:$12 sps:$4 sm:$0xff]  }
  0xea   :  { %1737 = vmatpush1.bf16.msra.mxu1 %v4135_v4  ;;  %v4216_v4 = vld [vmem:[#allocation5 + $0x558] ss:$12 sps:$4 sm:$0xff]  }
  0xeb   :  { %1738 = vmatprep.subr.bf16.mxu1 %v4486_v47 }
  0xec   :  { %1491 = vmatpush1.bf16.msra.mxu0 %v4128_v2  ;;  %v4213_v2 = vld [vmem:[#allocation5 + $0x540] ss:$12 sps:$4 sm:$0xff]  }
  0xed   :  { %1505 = vmatprep.subr.bf16.mxu0 %v4134_v5  ;;  %v4221_v5 = vld [vmem:[#allocation5 + $0x574] ss:$12 sps:$4 sm:$0xff]  }
  0xee   :  { %1739 = vmatpush1.bf16.msra.mxu1 %v4139_v7  ;;  %v4224_v7 = vld [vmem:[#allocation5 + $0x58c] ss:$12 sps:$4 sm:$0xff]  }
  0xef   :  { %1493 = vmatmul.mubr.f32.vlgmr.msra.gmra.mrb[0].mxu0 %v4634_v11  ;;  %1740 = vmatprep.subr.bf16.mxu1 %v4486_v47  ;;  %v4146_v11 = vld [vmem:[#allocation5 + $0x34c] ss:$12 sps:$4 sm:$0xff]  }
  0xf0   :  { %1506 = vmatpush1.bf16.msra.mxu0 %v4132_v6  ;;  %1498 = vmatprep.mubr.f32.mxu0 %v4637_v27  ;;  %v4163_v27 = vld [vmem:[#allocation5 + $0x5c0] ss:$12 sps:$4 sm:$0xff]   ;;  %v4219_v6 = vld [vmem:[#allocation5 + $0x570] ss:$12 sps:$4 sm:$0xff]  }
  0xf1   :  { %1507 = vmatprep.subr.bf16.mxu0 %v4138_v8  ;;  %v4222_v8 = vld [vmem:[#allocation5 + $0x588] ss:$12 sps:$4 sm:$0xff]  }
  0xf2   :  { %1741 = vmatpush1.bf16.msra.mxu1 %v4143_v10  ;;  %v4225_v10 = vld [vmem:[#allocation5 + $0x5a0] ss:$12 sps:$4 sm:$0xff]  }
  0xf3   :  { %1499 = vmatmul.mubr.f32.gmra.mrb[2].mxu0 %v4640_v31  ;;  %1742 = vmatprep.subr.bf16.mxu1 %v4486_v47  ;;  %v4164_v31 = vld [vmem:[#allocation5 + $0x3c0] ss:$12 sps:$4 sm:$0xff]  }
  0xf4   :  { %1508 = vmatpush1.bf16.msra.mxu0 %v4136_v9  ;;  %1537 = vmatprep.mubr.f32.mxu0 %v4643_v32  ;;  %v4679_v32 = vld [vmem:[#allocation2 + $0x30] sm:$0xff] }
  0xf5   :  { %1509 = vmatprep.subr.bf16.mxu0 %v4142_v12  ;;  %v4227_v9 = vld [vmem:[#allocation5 + $0x5a4] ss:$12 sps:$4 sm:$0xff]   ;;  %v4230_v12 = vld [vmem:[#allocation5 + $0x5bc] ss:$12 sps:$4 sm:$0xff]  }
  0xf6   :  { %1743 = vmatpush1.bf16.msra.mxu1 %v4147_v14  ;;  %v4228_v14 = vld [vmem:[#allocation5 + $0x5b8] ss:$12 sps:$4 sm:$0xff]  }
  0xf7   :  { %1744 = vmatprep.subr.bf16.mxu1 %v4486_v47 }
  0xf8   :  { %1510 = vmatpush1.bf16.msra.mxu0 %v4140_v13  ;;  %v396_v13 = vld [vmem:[#allocation5 + $0x5d0] sm:$0xff] }
  0xf9   :  { %1511 = vmatprep.subr.bf16.mxu0 %v4146_v11  ;;  %v3469_v11 = vcombine.high %v396_v13, %v396_v13 }
  0xfa   :  { %1745 = vmatpush1.bf16.msra.mxu1 %v4151_v16 }
  0xfb   :  { %1746 = vmatprep.subr.bf16.mxu1 %v4486_v47 }
  0xfc   :  { %1512 = vmatpush1.bf16.msra.mxu0 %v4144_v15  ;;  %v3468_v15 = vcombine.low %v396_v13, %v396_v13  ;;  %v4251_v13 = vld [vmem:[#allocation7 + $0x90] sm:$0xff]  }
  0xfd   :  { %1513 = vmatprep.subr.bf16.mxu0 %v4150_v17 }
  0xfe   :  { %1747 = vmatpush1.bf16.msra.mxu1 %v4155_v19  ;;  %v1407_v16 = vsel %vm1405_vm1, %v3468_v15, 0  ;;  %v4233_v19 = vld [vmem:[#allocation7 + $0x40] sm:$0xff]   ;;  %v4254_v15 = vld [vmem:[#allocation7 + $0xa8] sm:$0xff]  }
  0xff   :  { %1748 = vmatprep.subr.bf16.mxu1 %v4486_v47 }
 0x100   :  { %1514 = vmatpush1.bf16.msra.mxu0 %v4148_v18 }
 0x101   :  { %1515 = vmatprep.subr.bf16.mxu0 %v4154_v20  ;;  %v4234_v20 = vld [vmem:[#allocation7] sm:$0xff]  }
 0x102   :  { %1749 = vmatpush1.bf16.msra.mxu1 %v4159_v22 }
 0x103   :  { %1750 = vmatprep.subr.bf16.mxu1 %v4486_v47 }
 0x104   :  { %1516 = vmatpush1.bf16.msra.mxu0 %v4152_v21  ;;  %v4235_v21 = vld [vmem:[#allocation7 + $0x48] sm:$0xff]  }
 0x105   :  { %1517 = vmatprep.subr.bf16.mxu0 %v4158_v23  ;;  %v4236_v23 = vld [vmem:[#allocation7 + $0x8] sm:$0xff]  }
 0x106   :  { %1751 = vmatpush1.bf16.msra.mxu1 %v4163_v27  ;;  %v4240_v27 = vld [vmem:[#allocation7 + $0x18] sm:$0xff]  }
 0x107   :  { %1752 = vmatprep.subr.bf16.mxu1 %v4486_v47  ;;  %v4183_v47 = vld [vmem:[#allocation5 + $0x450] ss:$12 sps:$4 sm:$0xff]  }
 0x108   :  { %1518 = vmatpush1.bf16.msra.mxu0 %v4156_v25  ;;  %v4238_v25 = vld [vmem:[#allocation7 + $0x10] sm:$0xff]  }
 0x109   :  { %1519 = vmatprep.subr.bf16.mxu0 %v4162_v26  ;;  %v4239_v26 = vld [vmem:[#allocation7 + $0x58] sm:$0xff]  }
 0x10a   :  { %1753 = vmatpush1.bf16.msra.mxu1 %v1413_v29  ;;  %v4242_v29 = vld [vmem:[#allocation7 + $0x20] sm:$0xff]  }
 0x10b   :  { %3649 = vmatprep.subr.bf16.mxu1 %v4233_v19 }
 0x10c   :  { %1520 = vmatpush1.bf16.msra.mxu0 %v4160_v28  ;;  %v4241_v28 = vld [vmem:[#allocation7 + $0x60] sm:$0xff]  }
 0x10d   :  { %1521 = vmatprep.subr.bf16.mxu0 %v4166_v30  ;;  %1757 = vmatmul.mubr.f32.vlgmr.msra.gmra.mrb[12].mxu1 %v4679_v32  ;;  %v4243_v30 = vld [vmem:[#allocation7 + $0x68] sm:$0xff]  }
 0x10e   :  { %3475 = vmatprep.mubr.msk.f32.mxu1 %vm1398_vm0, %v4681_v34  ;;  %3650 = vmatpush3.bf16.msra.mxu1 %v4234_v20 }
 0x10f   :  { %3651 = vmatprep.subr.bf16.mxu1 %v4235_v21 }
 0x110   :  { %1522 = vmatpush1.bf16.msra.mxu0 %v4164_v31 }
 0x111   :  { %1523 = vmatprep.subr.bf16.mxu0 %v4170_v33  ;;  %1762 = vmatmul.mubr.f32.gmra.mrb[14].mxu1 %v4683_v36  ;;  %v4244_v33 = vld [vmem:[#allocation7 + $0x28] sm:$0xff]  }
 0x112   :  { %3652 = vmatpush3.bf16.msra.mxu1 %v4236_v23 }
 0x113   :  { %3653 = vmatprep.subr.bf16.mxu1 %v4237_v24  ;;  %v3476_v24 = vld [vmem:[%s4934_s4] ss:$0 sm:$0xff] }
 0x114   :  { %1524 = vmatpush1.bf16.msra.mxu0 %v4168_v35 }
 0x115   :  { %1525 = vmatprep.subr.bf16.mxu0 %v4173_v37  ;;  %v4246_v37 = vld [vmem:[#allocation7 + $0x30] sm:$0xff]  }
 0x116   :  { %3654 = vmatpush3.bf16.msra.mxu1 %v4238_v25 }
 0x117   :  { %3655 = vmatprep.subr.bf16.mxu1 %v4239_v26 }
 0x118   :  { %1526 = vmatpush1.bf16.msra.mxu0 %v4171_v38  ;;  %v4248_v38 = vld [vmem:[#allocation7 + $0x38] sm:$0xff]  }
 0x119   :  { %1527 = vmatprep.subr.bf16.mxu0 %v4176_v39 }
 0x11a   :  { %3656 = vmatpush3.bf16.msra.mxu1 %v4240_v27 }
 0x11b   :  { %3657 = vmatprep.subr.bf16.mxu1 %v4241_v28 }
 0x11c   :  { %1528 = vmatpush1.bf16.msra.mxu0 %v4174_v40 }
 0x11d   :  { %1529 = vmatprep.subr.bf16.mxu0 %v4179_v41 }
 0x11e   :  { %3658 = vmatpush3.bf16.msra.mxu1 %v4242_v29 }
 0x11f   :  { %3659 = vmatprep.subr.bf16.mxu1 %v4243_v30 }
 0x120   :  { %1530 = vmatpush1.bf16.msra.mxu0 %v4177_v42 }
 0x121   :  { %1531 = vmatprep.subr.bf16.mxu0 %v4182_v43 }
 0x122   :  { %3660 = vmatpush3.bf16.msra.mxu1 %v4244_v33 }
 0x124   :  { %1532 = vmatpush1.bf16.msra.mxu0 %v4180_v44 }
 0x125   :  { %1533 = vmatprep.subr.bf16.mxu0 %v4185_v46 }
 0x128   :  { %1534 = vmatpush1.bf16.msra.mxu0 %v4183_v47 }
 0x129   :  { %1535 = vmatprep.subr.bf16.mxu0 %v4188_v48 }
 0x12c   :  { %1536 = vmatpush1.bf16.msra.mxu0 %v4186_v49 }
 0x12d   :  { %1550 = vmatprep.subr.bf16.mxu0 %v4191_v50 }
 0x12f   :  { %1538 = vmatmul.mubr.f32.vlgmr.msra.gmra.mrb[0].mxu0 %v4646_v45  ;;  %v4201_v45 = vld [vmem:[#allocation5 + $0x4e0] ss:$12 sps:$4 sm:$0xff]  }
 0x130   :  { %1551 = vmatpush1.bf16.msra.mxu0 %v4189_v51  ;;  %1543 = vmatprep.mubr.f32.mxu0 %v4654_v63  ;;  %v4212_v63 = vld [vmem:[#allocation5 + $0x52c] ss:$12 sps:$4 sm:$0xff]  }
 0x131   :  { %1552 = vmatprep.subr.bf16.mxu0 %v4194_v52 }
 0x133   :  { %1544 = vmatmul.mubr.f32.gmra.mrb[2].mxu0 %v4656_v0  ;;  %v4210_v0 = vld [vmem:[#allocation5 + $0x528] ss:$12 sps:$4 sm:$0xff]  }
 0x134   :  { %1553 = vmatpush1.bf16.msra.mxu0 %v4192_v53  ;;  %3472 = vmatprep.mubr.msk.f32.mxu0 %vm1398_vm0, %v4661_v3  ;;  %v4218_v3 = vld [vmem:[#allocation5 + $0x55c] ss:$12 sps:$4 sm:$0xff]  }
 0x135   :  { %1554 = vmatprep.subr.bf16.mxu0 %v4197_v54 }
 0x138   :  { %1555 = vmatpush1.bf16.msra.mxu0 %v4195_v55 }
 0x139   :  { %1556 = vmatprep.subr.bf16.mxu0 %v4200_v56  ;;  %v4249_v56 = vld [vmem:[#allocation7 + $0x80] sm:$0xff]  }
 0x13c   :  { %1557 = vmatpush1.bf16.msra.mxu0 %v4198_v57  ;;  %v4700_v57 = vld [vmem:[#allocation8] sm:$0xff]  }
 0x13d   :  { %1558 = vmatprep.subr.bf16.mxu0 %v4203_v58  ;;  %v4487_v58 = vmov 0.0  }
 0x140   :  { %1559 = vmatpush1.bf16.msra.mxu0 %v4201_v45 }
 0x141   :  { %1560 = vmatprep.subr.bf16.mxu0 %v4206_v59 }
 0x144   :  { %1561 = vmatpush1.bf16.msra.mxu0 %v4204_v60 }
 0x145   :  { %1562 = vmatprep.subr.bf16.mxu0 %v4209_v61  ;;  %v4705_v61 = vld [vmem:[#allocation8 + $0x8] sm:$0xff]  }
 0x148   :  { %1563 = vmatpush1.bf16.msra.mxu0 %v4207_v62 }
 0x149   :  { %1564 = vmatprep.subr.bf16.mxu0 %v4212_v63 }
 0x14c   :  { %1565 = vmatpush1.bf16.msra.mxu0 %v4210_v0 }
 0x14d   :  { %1566 = vmatprep.subr.bf16.mxu0 %v4215_v1  ;;  %v4709_v1 = vld [vmem:[#allocation8 + $0x10] sm:$0xff]  }
 0x150   :  { %1567 = vmatpush1.bf16.msra.mxu0 %v4213_v2  ;;  %v4713_v2 = vld [vmem:[#allocation8 + $0x18] sm:$0xff]  }
 0x151   :  { %1568 = vmatprep.subr.bf16.mxu0 %v4218_v3  ;;  %v4717_v3 = vld [vmem:[#allocation8 + $0x20] sm:$0xff]  }
 0x154   :  { %1569 = vmatpush1.bf16.msra.mxu0 %v4216_v4  ;;  %v4721_v4 = vld [vmem:[#allocation8 + $0x28] sm:$0xff]  }
 0x155   :  { %1570 = vmatprep.subr.bf16.mxu0 %v4221_v5  ;;  %v4725_v5 = vld [vmem:[#allocation8 + $0x30] sm:$0xff]  }
 0x158   :  { %1571 = vmatpush1.bf16.msra.mxu0 %v4219_v6  ;;  %v4729_v6 = vld [vmem:[#allocation8 + $0x38] sm:$0xff]  }
 0x159   :  { %1572 = vmatprep.subr.bf16.mxu0 %v4224_v7 }
 0x15c   :  { %1573 = vmatpush1.bf16.msra.mxu0 %v4222_v8 }
 0x15d   :  { %1574 = vmatprep.subr.bf16.mxu0 %v4227_v9  ;;  %v4250_v9 = vld [vmem:[#allocation7 + $0x88] sm:$0xff]  }
 0x160   :  { %1575 = vmatpush1.bf16.msra.mxu0 %v4225_v10 }
 0x161   :  { %1576 = vmatprep.subr.bf16.mxu0 %v4230_v12 }
 0x164   :  { %1577 = vmatpush1.bf16.msra.mxu0 %v4228_v14  ;;  %v3599_v17 = vpop.f32.mrb[0].mxu1  ;;  %v4252_v14 = vld [vmem:[#allocation7 + $0x98] sm:$0xff]  }
 0x165   :  { %3471 = vmatprep.subr.msk.bf16.mxu0 %vm1405_vm1, %v3469_v11  ;;  %v3600_v18 = vpop.f32.mrb[1].mxu1  ;;  %v4253_v11 = vld [vmem:[#allocation7 + $0xa0] sm:$0xff]  }
 0x166   :  { %v3601_v22 = vadd.f32 %v3600_v18, %v3599_v17  ;;  %v4256_v17 = vld [vmem:[#allocation7 + $0xb8] sm:$0xff]  }
 0x168   :  { %1579 = vmatpush1.bf16.msra.mxu0 %v1407_v16  ;;  %v3602_v31 = vpop.f32.mrb[2].mxu1  ;;  %v4255_v16 = vld [vmem:[#allocation7 + $0xb0] sm:$0xff]  }
 0x169   :  { %3800 = vmatprep.subr.bf16.mxu0 %v4487_v58 }
 0x16b   :  { %1583 = vmatmul.mubr.f32.vlgmr.msra.gmra.mrb[0].mxu0 %v4679_v32  ;;  %v3603_v32 = vpop.f32.mrb[3].mxu1 }
 0x16c   :  { %3473 = vmatprep.mubr.msk.f32.mxu0 %vm1398_vm0, %v4681_v34  ;;  %v3604_v35 = vadd.f32 %v3603_v32, %v3602_v31  ;;  %v4245_v34 = vld [vmem:[#allocation7 + $0x70] sm:$0xff]   ;;  %3801 = vmatpush3.bf16.msra.mxu0 %v4700_v57 }
 0x16d   :  { %3661 = vmatprep.subr.bf16.mxu1 %v4245_v34  ;;  %3802 = vmatprep.subr.bf16.mxu0 %v4487_v58 }
 0x16e   :  { %3662 = vmatpush3.bf16.msra.mxu1 %v4246_v37 }
 0x16f   :  { %1589 = vmatmul.mubr.f32.gmra.mrb[2].mxu0 %v4683_v36  ;;  %v4247_v36 = vld [vmem:[#allocation7 + $0x78] sm:$0xff]  }
 0x170   :  { %3663 = vmatprep.subr.bf16.mxu1 %v4247_v36  ;;  %3803 = vmatpush3.bf16.msra.mxu0 %v4705_v61 }
 0x171   :  { %3804 = vmatprep.subr.bf16.mxu0 %v4487_v58  ;;  %3816 = vmatprep.mubr.msk.f32.mxu0 %vm4488_vm2, %v4487_v58 }
 0x172   :  { %3664 = vmatpush3.bf16.msra.mxu1 %v4248_v38 }
 0x173   :  { %3762 = vmatprep.subr.bf16.mxu1 %v4249_v56 }
 0x174   :  { %3805 = vmatpush3.bf16.msra.mxu0 %v4709_v1 }
 0x175   :  { %3806 = vmatprep.subr.bf16.mxu0 %v4487_v58 }
 0x178   :  { %3807 = vmatpush3.bf16.msra.mxu0 %v4713_v2 }
 0x179   :  { %3808 = vmatprep.subr.bf16.mxu0 %v4487_v58 }
 0x17c   :  { %3809 = vmatpush3.bf16.msra.mxu0 %v4717_v3 }
 0x17d   :  { %3810 = vmatprep.subr.bf16.mxu0 %v4487_v58 }
 0x180   :  { %3811 = vmatpush3.bf16.msra.mxu0 %v4721_v4 }
 0x181   :  { %3812 = vmatprep.subr.bf16.mxu0 %v4487_v58 }
 0x184   :  { %v3621_v39 = vpop.f32.mrb[4].mxu1  ;;  %3813 = vmatpush3.bf16.msra.mxu0 %v4725_v5 }
 0x185   :  { %v3622_v40 = vpop.f32.mrb[5].mxu1  ;;  %3814 = vmatprep.subr.bf16.mxu0 %v4487_v58 }
 0x186   :  { %v3623_v41 = vadd.f32 %v3622_v40, %v3621_v39 }
 0x188   :  { %v1673_v42 = vadd.f32 %v3623_v41, %v3601_v22  ;;  %v3624_v43 = vpop.f32.mrb[6].mxu1  ;;  %3815 = vmatpush3.bf16.msra.mxu0 %v4729_v6 }
 0x189   :  { %v3625_v44 = vpop.f32.mrb[7].mxu1  ;;  %3838 = vmatprep.subr.bf16.mxu0 %v4487_v58 }
 0x18a   :  { %v3626_v46 = vadd.f32 %v3625_v44, %v3624_v43 }
 0x18c   :  { %v1678_v47 = vadd.f32 %v3626_v46, %v3604_v35 }
 0x1a4   :  { %v3643_v48 = vpop.f32.mrb[8].mxu1 }
 0x1a5   :  { %v3644_v49 = vpop.f32.mrb[9].mxu1 }
 0x1a6   :  { %v3645_v50 = vadd.f32 %v3644_v49, %v3643_v48 }
 0x1a8   :  { %v1716_v51 = vadd.f32 %v3645_v50, %v1673_v42  ;;  %v3646_v52 = vpop.f32.mrb[10].mxu1 }
 0x1a9   :  { %v3647_v53 = vpop.f32.mrb[11].mxu1 }
 0x1aa   :  { %v3648_v54 = vadd.f32 %v3647_v53, %v3646_v52 }
 0x1ac   :  { %v1721_v55 = vadd.f32 %v3648_v54, %v1678_v47 }
 0x1e0   :  { %v1758_v45 = vpop.f32.mrb[12].mxu1 }
 0x1e1   :  { %v1759_v59 = vadd.f32 %v1758_v45, %v1716_v51  ;;  %v1760_v60 = vpop.f32.mrb[13].mxu1 }
 0x1e4   :  { %v1763_v62 = vpop.f32.mrb[14].mxu1 }
 0x1e5   :  { %v1764_v63 = vadd.f32 %v1763_v62, %v1721_v55  ;;  %v1765_v0 = vpop.f32.mrb[15].mxu1 }
 0x23e   :  { %v1584_v7 = vpop.f32.mrb[0].mxu0 }
 0x23f   :  { %v1586_v8 = vpop.f32.mrb[1].mxu0 }
 0x240   :  { %1998 = vmatprep.mubr.f32.mxu1 %v1586_v8 }
 0x241   :  { %1999 = vmatmul.mubr.f32.vlgmr.msra.gmra.mrb[16].mxu1 %v1584_v7 }
 0x242   :  { %3763 = vmatpush3.bf16.msra.mxu1 %v4249_v56  ;;  %v1590_v10 = vpop.f32.mrb[2].mxu0 }
 0x243   :  { %v1592_v12 = vpop.f32.mrb[3].mxu0  ;;  %3764 = vmatprep.subr.bf16.mxu1 %v4250_v9 }
 0x244   :  { %2003 = vmatprep.mubr.f32.mxu1 %v1592_v12 }
 0x245   :  { %2004 = vmatmul.mubr.f32.gmra.mrb[18].mxu1 %v1590_v10 }
 0x246   :  { %3765 = vmatpush3.bf16.msra.mxu1 %v4250_v9  ;;  %3778 = vmatprep.mubr.f32.mxu1 %v1759_v59 }
 0x247   :  { %3766 = vmatprep.subr.bf16.mxu1 %v4251_v13 }
 0x24a   :  { %3767 = vmatpush3.bf16.msra.mxu1 %v4251_v13 }
 0x24b   :  { %3768 = vmatprep.subr.bf16.mxu1 %v4252_v14 }
 0x24e   :  { %3769 = vmatpush3.bf16.msra.mxu1 %v4252_v14 }
 0x24f   :  { %3770 = vmatprep.subr.bf16.mxu1 %v4253_v11 }
 0x252   :  { %3771 = vmatpush3.bf16.msra.mxu1 %v4253_v11 }
 0x253   :  { %3772 = vmatprep.subr.bf16.mxu1 %v4254_v15 }
 0x256   :  { %3773 = vmatpush3.bf16.msra.mxu1 %v4254_v15 }
 0x257   :  { %3774 = vmatprep.subr.bf16.mxu1 %v4255_v16 }
 0x25a   :  { %3775 = vmatpush3.bf16.msra.mxu1 %v4255_v16 }
 0x25b   :  { %3776 = vmatprep.subr.bf16.mxu1 %v4256_v17 }
 0x25e   :  { %3777 = vmatpush3.bf16.msra.mxu1 %v4256_v17 }
 0x25f   :  { %3781 = vmatprep.subr.bf16.mxu1 %v4487_v58 }
 0x261   :  { %3779 = vmatmul.mubr.f32.vlgmr.msra.gmra.mrb[20].mxu1 %v1764_v63 }
 0x262   :  { %3782 = vmatpush3.bf16.msra.mxu1 %v4700_v57  ;;  %3797 = vmatprep.mubr.msk.f32.mxu1 %vm4488_vm2, %v4487_v58 }
 0x263   :  { %3783 = vmatprep.subr.bf16.mxu1 %v4487_v58 }
 0x266   :  { %3784 = vmatpush3.bf16.msra.mxu1 %v4705_v61 }
 0x267   :  { %3785 = vmatprep.subr.bf16.mxu1 %v4487_v58 }
 0x26a   :  { %3786 = vmatpush3.bf16.msra.mxu1 %v4709_v1 }
 0x26b   :  { %3787 = vmatprep.subr.bf16.mxu1 %v4487_v58 }
 0x26e   :  { %3788 = vmatpush3.bf16.msra.mxu1 %v4713_v2 }
 0x26f   :  { %3789 = vmatprep.subr.bf16.mxu1 %v4487_v58 }
 0x272   :  { %3790 = vmatpush3.bf16.msra.mxu1 %v4717_v3 }
 0x273   :  { %3791 = vmatprep.subr.bf16.mxu1 %v4487_v58 }
 0x276   :  { %3792 = vmatpush3.bf16.msra.mxu1 %v4721_v4 }
 0x277   :  { %3793 = vmatprep.subr.bf16.mxu1 %v4487_v58 }
 0x27a   :  { %3794 = vmatpush3.bf16.msra.mxu1 %v4725_v5 }
 0x27b   :  { %3795 = vmatprep.subr.bf16.mxu1 %v4487_v58 }
 0x27e   :  { %3796 = vmatpush3.bf16.msra.mxu1 %v4729_v6 }
 0x27f   :  { %3819 = vmatprep.subr.bf16.mxu1 %v4487_v58 }
 0x281   :  { %3798 = vmatmul.mubr.f32.vlgmr.msra.gmra.mrb[22].mxu1 %v4487_v58 }
 0x282   :  { %3820 = vmatpush3.bf16.msra.mxu1 %v4700_v57  ;;  %3835 = vmatprep.mubr.msk.f32.mxu1 %vm4488_vm2, %v4487_v58 }
 0x283   :  { %3821 = vmatprep.subr.bf16.mxu1 %v4487_v58 }
 0x286   :  { %3822 = vmatpush3.bf16.msra.mxu1 %v4705_v61 }
 0x287   :  { %3823 = vmatprep.subr.bf16.mxu1 %v4487_v58 }
 0x28a   :  { %3824 = vmatpush3.bf16.msra.mxu1 %v4709_v1 }
 0x28b   :  { %3825 = vmatprep.subr.bf16.mxu1 %v4487_v58 }
 0x28e   :  { %3826 = vmatpush3.bf16.msra.mxu1 %v4713_v2 }
 0x28f   :  { %3827 = vmatprep.subr.bf16.mxu1 %v4487_v58 }
 0x292   :  { %3828 = vmatpush3.bf16.msra.mxu1 %v4717_v3 }
 0x293   :  { %3829 = vmatprep.subr.bf16.mxu1 %v4487_v58 }
 0x296   :  { %3830 = vmatpush3.bf16.msra.mxu1 %v4721_v4 }
 0x297   :  { %3831 = vmatprep.subr.bf16.mxu1 %v4487_v58 }
 0x29a   :  { %3832 = vmatpush3.bf16.msra.mxu1 %v4725_v5 }
 0x29b   :  { %3833 = vmatprep.subr.bf16.mxu1 %v4487_v58 }
 0x29e   :  { %3834 = vmatpush3.bf16.msra.mxu1 %v4729_v6 }
 0x29f   :  { %3857 = vmatprep.subr.bf16.mxu1 %v4487_v58 }
 0x314   :  { %v3665_v18 = vpop.f32.mrb[16].mxu1 }
 0x315   :  { %v3666_v19 = vpop.f32.mrb[17].mxu1 }
 0x316   :  { %v3667_v20 = vadd.f32 %v3666_v19, %v3665_v18 }
 0x318   :  { %v3668_v21 = vpop.f32.mrb[18].mxu1  ;;  %v2001_v27 = vadd.f32 %v3667_v20, %v3476_v24 }
 0x319   :  { %v3669_v22 = vpop.f32.mrb[19].mxu1 }
 0x31a   :  { %v3670_v23 = vadd.f32 %v3669_v22, %v3668_v21 }
 0x31c   :  { %v2006_v25 = vadd.f32 %v3670_v23, %v3476_v24 }
 0x334   :  { %v3780_v26 = vpop.f32.mrb[20].mxu1 }
 0x335   :  { %v4776_v28 = vadd.f32 %v3780_v26, %v2006_v25  ;;  %v2043_v29 = vpop.f32.mrb[21].mxu1 }
 0x336   :  { %v4778_v30 = vadd.f32 %v2043_v29, %v2001_v27 }
 0x354   :  { %v2134_v31 = vpop.f32.mrb[22].mxu1 }
 0x355   :  { %v2139_v32 = vrot.slane %v2134_v31, 1  ;;  %v3799_v33 = vpop.f32.mrb[23].mxu1  ;;  %v2142_v35 = vadd.f32 %v2134_v31, %v4778_v30 }
 0x356   :  { %v4266_v33 = vld [vmem:[#allocation10 + $0x8] sm:$0xff]  }
 0x357   :  { %v2143_v34 = vadd.f32 %v2139_v32, %v4776_v28 }
 0x359   :  { %4273 = vtanh.f32 %v2143_v34 }
 0x35a   :  { %4275 = vtanh.f32 %v2142_v35  ;;  %v4267_v35 = vld [vmem:[#allocation10 + $0x10] sm:$0xff]  }
 0x363   :  { %v4274_v37 = vpop.eup %4273 }
 0x364   :  { %v2148_v36 = vrot.slane %v4274_v37, 7  ;;  %v4276_v38 = vpop.eup %4275 }
 0x366   :  { %v2150_v39 = vsel %vm2149_vm3, %v2148_v36, %v4276_v38 }
 0x367   :  { %3817 = vmatmul.mubr.f32.vlgmr.msra.gmra.mrb[4].mxu0 %v2150_v39 }
 0x368   :  { %3839 = vmatpush3.bf16.msra.mxu0 %v4700_v57  ;;  %3854 = vmatprep.mubr.msk.f32.mxu0 %vm4488_vm2, %v4487_v58 }
 0x369   :  { %3840 = vmatprep.subr.bf16.mxu0 %v4487_v58 }
 0x36c   :  { %3841 = vmatpush3.bf16.msra.mxu0 %v4705_v61 }
 0x36d   :  { %3842 = vmatprep.subr.bf16.mxu0 %v4487_v58 }
 0x370   :  { %3843 = vmatpush3.bf16.msra.mxu0 %v4709_v1 }
 0x371   :  { %3844 = vmatprep.subr.bf16.mxu0 %v4487_v58 }
 0x374   :  { %3845 = vmatpush3.bf16.msra.mxu0 %v4713_v2 }
 0x375   :  { %3846 = vmatprep.subr.bf16.mxu0 %v4487_v58 }
 0x378   :  { %3847 = vmatpush3.bf16.msra.mxu0 %v4717_v3 }
 0x379   :  { %3848 = vmatprep.subr.bf16.mxu0 %v4487_v58 }
 0x37c   :  { %3849 = vmatpush3.bf16.msra.mxu0 %v4721_v4 }
 0x37d   :  { %3850 = vmatprep.subr.bf16.mxu0 %v4487_v58 }
 0x380   :  { %3851 = vmatpush3.bf16.msra.mxu0 %v4725_v5 }
 0x381   :  { %3852 = vmatprep.subr.bf16.mxu0 %v4487_v58 }
 0x384   :  { %3853 = vmatpush3.bf16.msra.mxu0 %v4729_v6 }
 0x385   :  { %3876 = vmatprep.subr.bf16.mxu0 %v4487_v58 }
 0x43a   :  { %v2186_v40 = vpop.f32.mrb[4].mxu0 }
 0x43b   :  { %v2191_v41 = vrot.slane %v2186_v40, 7  ;;  %v3818_v42 = vpop.f32.mrb[5].mxu0  ;;  %v2195_v44 = vadd.f32 %v2186_v40, %v4776_v28 }
 0x43d   :  { %v2194_v43 = vadd.f32 %v2191_v41, %v4778_v30 }
 0x43f   :  { %4277 = vtanh.f32 %v2194_v43 }
 0x440   :  { %4279 = vtanh.f32 %v2195_v44 }
 0x449   :  { %v4278_v46 = vpop.eup %4277 }
 0x44a   :  { %v2200_v47 = vrot.slane %v4278_v46, 1  ;;  %v4280_v48 = vpop.eup %4279 }
 0x44c   :  { %v2201_v49 = vsel %vm2149_vm3, %v4280_v48, %v2200_v47  ;;  %v4268_v47 = vld [vmem:[#allocation10 + $0x18] sm:$0xff]   ;;  %v4269_v48 = vld [vmem:[#allocation10 + $0x20] sm:$0xff]  }
 0x44d   :  { %3836 = vmatmul.mubr.f32.vlgmr.msra.gmra.mrb[24].mxu1 %v2201_v49  ;;  %v4270_v49 = vld [vmem:[#allocation10 + $0x28] sm:$0xff]  }
 0x44e   :  { %3858 = vmatpush3.bf16.msra.mxu1 %v4700_v57  ;;  %3873 = vmatprep.mubr.msk.f32.mxu1 %vm4488_vm2, %v4487_v58 }
 0x44f   :  { %3859 = vmatprep.subr.bf16.mxu1 %v4487_v58 }
 0x452   :  { %3860 = vmatpush3.bf16.msra.mxu1 %v4705_v61 }
 0x453   :  { %3861 = vmatprep.subr.bf16.mxu1 %v4487_v58 }
 0x456   :  { %3862 = vmatpush3.bf16.msra.mxu1 %v4709_v1 }
 0x457   :  { %3863 = vmatprep.subr.bf16.mxu1 %v4487_v58 }
 0x45a   :  { %3864 = vmatpush3.bf16.msra.mxu1 %v4713_v2 }
 0x45b   :  { %3865 = vmatprep.subr.bf16.mxu1 %v4487_v58 }
 0x45e   :  { %3866 = vmatpush3.bf16.msra.mxu1 %v4717_v3 }
 0x45f   :  { %3867 = vmatprep.subr.bf16.mxu1 %v4487_v58 }
 0x462   :  { %3868 = vmatpush3.bf16.msra.mxu1 %v4721_v4 }
 0x463   :  { %3869 = vmatprep.subr.bf16.mxu1 %v4487_v58 }
 0x466   :  { %3870 = vmatpush3.bf16.msra.mxu1 %v4725_v5 }
 0x467   :  { %3871 = vmatprep.subr.bf16.mxu1 %v4487_v58 }
 0x46a   :  { %3872 = vmatpush3.bf16.msra.mxu1 %v4729_v6 }
 0x46b   :  { %3895 = vmatprep.subr.bf16.mxu1 %v4487_v58 }
 0x520   :  { %v2237_v50 = vpop.f32.mrb[24].mxu1 }
 0x521   :  { %v2242_v51 = vrot.slane %v2237_v50, 6  ;;  %v2243_v52 = vrot.slane %v2237_v50, 7  ;;  %v3837_v53 = vpop.f32.mrb[25].mxu1  ;;  %v4271_v50 = vld [vmem:[#allocation10 + $0x30] sm:$0xff]  }
 0x522   :  { %v2640_v53 = vld [vmem:[#allocation11 + $0x20] sm:$0xff] }
 0x523   :  { %v2246_v54 = vadd.f32 %v2242_v51, %v4778_v30  ;;  %v2247_v55 = vadd.f32 %v2243_v52, %v4776_v28  ;;  %v4272_v51 = vld [vmem:[#allocation10 + $0x38] sm:$0xff]   ;;  %v2636_v52 = vld [vmem:[#allocation11] sm:$0xff] }
 0x525   :  { %4281 = vtanh.f32 %v2246_v54  ;;  %v2637_v54 = vld [vmem:[#allocation11 + $0x8] sm:$0xff] }
 0x526   :  { %4283 = vtanh.f32 %v2247_v55  ;;  %v3519_v55 = vcombine.low %v2636_v52, %v2640_v53 }
 0x52f   :  { %v4282_v56 = vpop.eup %4281 }
 0x530   :  { %v4284_v45 = vpop.eup %4283  ;;  %v2252_v59 = vrot.slane %v4282_v56, 2  ;;  %v3520_v56 = vcombine.high %v2636_v52, %v2640_v53  ;;  %v2689_v53 = vld [vmem:[#allocation11 + $0x1a8] sm:$0xff] }
 0x531   :  { %v2253_v60 = vrot.slane %v4284_v45, 1  ;;  %v2641_v45 = vld [vmem:[#allocation11 + $0x28] sm:$0xff] }
 0x533   :  { %v2254_v62 = vsel %vm2149_vm3, %v2253_v60, %v2252_v59  ;;  %v3521_v59 = vcombine.low %v2637_v54, %v2641_v45  ;;  %v3522_v60 = vcombine.high %v2637_v54, %v2641_v45  ;;  %v2692_v54 = vld [vmem:[#allocation11 + $0x1c0] sm:$0xff] }
 0x534   :  { %3855 = vmatmul.mubr.f32.vlgmr.msra.gmra.mrb[6].mxu0 %v2254_v62 }
 0x535   :  { %3877 = vmatpush3.bf16.msra.mxu0 %v4700_v57  ;;  %3892 = vmatprep.mubr.msk.f32.mxu0 %vm4488_vm2, %v4487_v58 }
 0x536   :  { %3878 = vmatprep.subr.bf16.mxu0 %v4487_v58 }
 0x539   :  { %3879 = vmatpush3.bf16.msra.mxu0 %v4705_v61 }
 0x53a   :  { %3880 = vmatprep.subr.bf16.mxu0 %v4487_v58 }
 0x53d   :  { %3881 = vmatpush3.bf16.msra.mxu0 %v4709_v1 }
 0x53e   :  { %3882 = vmatprep.subr.bf16.mxu0 %v4487_v58 }
 0x541   :  { %3883 = vmatpush3.bf16.msra.mxu0 %v4713_v2 }
 0x542   :  { %3884 = vmatprep.subr.bf16.mxu0 %v4487_v58 }
 0x545   :  { %3885 = vmatpush3.bf16.msra.mxu0 %v4717_v3 }
 0x546   :  { %3886 = vmatprep.subr.bf16.mxu0 %v4487_v58 }
 0x549   :  { %3887 = vmatpush3.bf16.msra.mxu0 %v4721_v4 }
 0x54a   :  { %3888 = vmatprep.subr.bf16.mxu0 %v4487_v58 }
 0x54d   :  { %3889 = vmatpush3.bf16.msra.mxu0 %v4725_v5 }
 0x54e   :  { %3890 = vmatprep.subr.bf16.mxu0 %v4487_v58 }
 0x551   :  { %3891 = vmatpush3.bf16.msra.mxu0 %v4729_v6 }
 0x552   :  { %3914 = vmatprep.subr.bf16.mxu0 %v4487_v58 }
 0x607   :  { %v2290_v63 = vpop.f32.mrb[6].mxu0 }
 0x608   :  { %v2295_v0 = vrot.slane %v2290_v63, 5  ;;  %v2296_v7 = vrot.slane %v2290_v63, 6  ;;  %v3856_v8 = vpop.f32.mrb[7].mxu0 }
 0x60a   :  { %v2299_v9 = vadd.f32 %v2295_v0, %v4778_v30  ;;  %v2300_v10 = vadd.f32 %v2296_v7, %v4776_v28 }
 0x60c   :  { %4285 = vtanh.f32 %v2299_v9 }
 0x60d   :  { %4287 = vtanh.f32 %v2300_v10 }
 0x616   :  { %v4286_v12 = vpop.eup %4285 }
 0x617   :  { %v4288_v13 = vpop.eup %4287  ;;  %v2305_v14 = vrot.slane %v4286_v12, 3 }
 0x618   :  { %v2306_v11 = vrot.slane %v4288_v13, 2 }
 0x61a   :  { %v2307_v15 = vsel %vm2149_vm3, %v2306_v11, %v2305_v14 }
 0x61b   :  { %3874 = vmatmul.mubr.f32.vlgmr.msra.gmra.mrb[26].mxu1 %v2307_v15  ;;  %v2644_v15 = vld [vmem:[#allocation11 + $0x40] sm:$0xff] }
 0x61c   :  { %3896 = vmatpush3.bf16.msra.mxu1 %v4700_v57  ;;  %3911 = vmatprep.mubr.msk.f32.mxu1 %vm4488_vm2, %v4487_v58 }
 0x61d   :  { %3897 = vmatprep.subr.bf16.mxu1 %v4487_v58 }
 0x620   :  { %3898 = vmatpush3.bf16.msra.mxu1 %v4705_v61 }
 0x621   :  { %3899 = vmatprep.subr.bf16.mxu1 %v4487_v58 }
 0x624   :  { %3900 = vmatpush3.bf16.msra.mxu1 %v4709_v1 }
 0x625   :  { %3901 = vmatprep.subr.bf16.mxu1 %v4487_v58 }
 0x628   :  { %3902 = vmatpush3.bf16.msra.mxu1 %v4713_v2 }
 0x629   :  { %3903 = vmatprep.subr.bf16.mxu1 %v4487_v58 }
 0x62c   :  { %3904 = vmatpush3.bf16.msra.mxu1 %v4717_v3 }
 0x62d   :  { %3905 = vmatprep.subr.bf16.mxu1 %v4487_v58 }
 0x630   :  { %3906 = vmatpush3.bf16.msra.mxu1 %v4721_v4 }
 0x631   :  { %3907 = vmatprep.subr.bf16.mxu1 %v4487_v58 }
 0x634   :  { %3908 = vmatpush3.bf16.msra.mxu1 %v4725_v5 }
 0x635   :  { %3909 = vmatprep.subr.bf16.mxu1 %v4487_v58 }
 0x638   :  { %3910 = vmatpush3.bf16.msra.mxu1 %v4729_v6 }
 0x639   :  { %3933 = vmatprep.subr.bf16.mxu1 %v4487_v58 }
 0x6ee   :  { %v2343_v16 = vpop.f32.mrb[26].mxu1 }
 0x6ef   :  { %v2348_v17 = vrot.slane %v2343_v16, 4  ;;  %v2349_v18 = vrot.slane %v2343_v16, 5  ;;  %v3875_v19 = vpop.f32.mrb[27].mxu1  ;;  %v2648_v16 = vld [vmem:[#allocation11 + $0x60] sm:$0xff] }
 0x6f0   :  { %v2649_v19 = vld [vmem:[#allocation11 + $0x68] sm:$0xff] }
 0x6f1   :  { %v2352_v20 = vadd.f32 %v2348_v17, %v4778_v30  ;;  %v2353_v21 = vadd.f32 %v2349_v18, %v4776_v28  ;;  %v2645_v17 = vld [vmem:[#allocation11 + $0x48] sm:$0xff]  ;;  %v3528_v18 = vcombine.high %v2644_v15, %v2648_v16 }
 0x6f3   :  { %4289 = vtanh.f32 %v2352_v20  ;;  %v3529_v20 = vcombine.low %v2645_v17, %v2649_v19 }
 0x6f4   :  { %4291 = vtanh.f32 %v2353_v21  ;;  %v2652_v21 = vld [vmem:[#allocation11 + $0x80] sm:$0xff] }
 0x6fd   :  { %v4290_v22 = vpop.eup %4289 }
 0x6fe   :  { %v4292_v23 = vpop.eup %4291  ;;  %v2358_v24 = vrot.slane %v4290_v22, 4  ;;  %v2656_v22 = vld [vmem:[#allocation11 + $0xa0] sm:$0xff] }
 0x6ff   :  { %v2359_v25 = vrot.slane %v4292_v23, 3  ;;  %v2653_v23 = vld [vmem:[#allocation11 + $0x88] sm:$0xff] }
 0x701   :  { %v2360_v26 = vsel %vm2149_vm3, %v2359_v25, %v2358_v24  ;;  %v3536_v24 = vcombine.high %v2652_v21, %v2656_v22  ;;  %v2657_v25 = vld [vmem:[#allocation11 + $0xa8] sm:$0xff] }
 0x702   :  { %3893 = vmatmul.mubr.f32.vlgmr.msra.gmra.mrb[8].mxu0 %v2360_v26  ;;  %v3535_v26 = vcombine.low %v2652_v21, %v2656_v22  ;;  %v2646_v21 = vld [vmem:[#allocation11 + $0x50] sm:$0xff] }
 0x703   :  { %3915 = vmatpush3.bf16.msra.mxu0 %v4700_v57  ;;  %3930 = vmatprep.mubr.msk.f32.mxu0 %vm4488_vm2, %v4487_v58  ;;  %v2650_v22 = vld [vmem:[#allocation11 + $0x70] sm:$0xff] }
 0x704   :  { %3916 = vmatprep.subr.bf16.mxu0 %v4487_v58 }
 0x707   :  { %3917 = vmatpush3.bf16.msra.mxu0 %v4705_v61 }
 0x708   :  { %3918 = vmatprep.subr.bf16.mxu0 %v4487_v58 }
 0x70b   :  { %3919 = vmatpush3.bf16.msra.mxu0 %v4709_v1 }
 0x70c   :  { %3920 = vmatprep.subr.bf16.mxu0 %v4487_v58 }
 0x70f   :  { %3921 = vmatpush3.bf16.msra.mxu0 %v4713_v2 }
 0x710   :  { %3922 = vmatprep.subr.bf16.mxu0 %v4487_v58 }
 0x713   :  { %3923 = vmatpush3.bf16.msra.mxu0 %v4717_v3 }
 0x714   :  { %3924 = vmatprep.subr.bf16.mxu0 %v4487_v58 }
 0x717   :  { %3925 = vmatpush3.bf16.msra.mxu0 %v4721_v4 }
 0x718   :  { %3926 = vmatprep.subr.bf16.mxu0 %v4487_v58 }
 0x71b   :  { %3927 = vmatpush3.bf16.msra.mxu0 %v4725_v5 }
 0x71c   :  { %3928 = vmatprep.subr.bf16.mxu0 %v4487_v58 }
 0x71f   :  { %3929 = vmatpush3.bf16.msra.mxu0 %v4729_v6  ;;  %v4265_v6 = vld [vmem:[#allocation10] sm:$0xff]  }
 0x720   :  { %3062 = vmatprep.subr.bf16.mxu0 %v3520_v56 }
 0x7d5   :  { %v2396_v57 = vpop.f32.mrb[8].mxu0 }
 0x7d6   :  { %v2401_v61 = vrot.slane %v2396_v57, 3  ;;  %v2402_v1 = vrot.slane %v2396_v57, 4  ;;  %v3894_v2 = vpop.f32.mrb[9].mxu0  ;;  %v3537_v57 = vcombine.low %v2653_v23, %v2657_v25 }
 0x7d7   :  { %v2664_v2 = vld [vmem:[#allocation11 + $0xe0] sm:$0xff] }
 0x7d8   :  { %v2405_v27 = vadd.f32 %v2401_v61, %v4778_v30  ;;  %v2406_v3 = vadd.f32 %v2402_v1, %v4776_v28  ;;  %v3538_v61 = vcombine.high %v2653_v23, %v2657_v25  ;;  %v2660_v1 = vld [vmem:[#allocation11 + $0xc0] sm:$0xff]  ;;  %v2647_v23 = vld [vmem:[#allocation11 + $0x58] sm:$0xff]  ;;  %v3532_v25 = vcombine.high %v2646_v21, %v2650_v22 }
 0x7da   :  { %4293 = vtanh.f32 %v2405_v27  ;;  %v2661_v27 = vld [vmem:[#allocation11 + $0xc8] sm:$0xff] }
 0x7db   :  { %4295 = vtanh.f32 %v2406_v3  ;;  %v3544_v3 = vcombine.high %v2660_v1, %v2664_v2 }
 0x7e4   :  { %v4294_v29 = vpop.eup %4293 }
 0x7e5   :  { %v4296_v4 = vpop.eup %4295  ;;  %v2411_v31 = vrot.slane %v4294_v29, 5  ;;  %v2665_v29 = vld [vmem:[#allocation11 + $0xe8] sm:$0xff] }
 0x7e6   :  { %v2412_v32 = vrot.slane %v4296_v4, 4  ;;  %v3543_v4 = vcombine.low %v2660_v1, %v2664_v2  ;;  %v2658_v1 = vld [vmem:[#allocation11 + $0xb0] sm:$0xff]  ;;  %v2655_v2 = vld [vmem:[#allocation11 + $0x98] sm:$0xff] }
 0x7e8   :  { %v2413_v5 = vsel %vm2149_vm3, %v2412_v32, %v2411_v31  ;;  %v3545_v31 = vcombine.low %v2661_v27, %v2665_v29  ;;  %v3546_v32 = vcombine.high %v2661_v27, %v2665_v29  ;;  %v2659_v27 = vld [vmem:[#allocation11 + $0xb8] sm:$0xff] }
 0x7e9   :  { %3912 = vmatmul.mubr.f32.vlgmr.msra.gmra.mrb[28].mxu1 %v2413_v5  ;;  %v2668_v5 = vld [vmem:[#allocation11 + $0x100] sm:$0xff] }
 0x7ea   :  { %3949 = vmatprep.mubr.msk.f32.mxu1 %vm4488_vm2, %v4487_v58  ;;  %3934 = vmatpush3.bf16.msra.mxu1 %v4265_v6  ;;  %v2672_v6 = vld [vmem:[#allocation11 + $0x120] sm:$0xff] }
 0x7eb   :  { %3935 = vmatprep.subr.bf16.mxu1 %v4487_v58 }
 0x7ee   :  { %3936 = vmatpush3.bf16.msra.mxu1 %v4266_v33  ;;  %v2669_v33 = vld [vmem:[#allocation11 + $0x108] sm:$0xff] }
 0x7ef   :  { %3937 = vmatprep.subr.bf16.mxu1 %v4487_v58 }
 0x7f2   :  { %3938 = vmatpush3.bf16.msra.mxu1 %v4267_v35  ;;  %v3552_v35 = vcombine.high %v2668_v5, %v2672_v6 }
 0x7f3   :  { %3939 = vmatprep.subr.bf16.mxu1 %v4487_v58 }
 0x7f6   :  { %3940 = vmatpush3.bf16.msra.mxu1 %v4268_v47 }
 0x7f7   :  { %3941 = vmatprep.subr.bf16.mxu1 %v4487_v58 }
 0x7fa   :  { %3942 = vmatpush3.bf16.msra.mxu1 %v4269_v48  ;;  %v2684_v48 = vld [vmem:[#allocation11 + $0x180] sm:$0xff] }
 0x7fb   :  { %3943 = vmatprep.subr.bf16.mxu1 %v4487_v58 }
 0x7fe   :  { %3944 = vmatpush3.bf16.msra.mxu1 %v4270_v49  ;;  %v2688_v49 = vld [vmem:[#allocation11 + $0x1a0] sm:$0xff] }
 0x7ff   :  { %3945 = vmatprep.subr.bf16.mxu1 %v4487_v58  ;;  %v3568_v52 = vcombine.high %v2684_v48, %v2688_v49 }
 0x802   :  { %3946 = vmatpush3.bf16.msra.mxu1 %v4271_v50  ;;  %v2685_v50 = vld [vmem:[#allocation11 + $0x188] sm:$0xff] }
 0x803   :  { %3947 = vmatprep.subr.bf16.mxu1 %v4487_v58  ;;  %v3569_v56 = vcombine.low %v2685_v50, %v2689_v53  ;;  %v3570_v45 = vcombine.high %v2685_v50, %v2689_v53 }
 0x806   :  { %3948 = vmatpush3.bf16.msra.mxu1 %v4272_v51  ;;  %v3567_v51 = vcombine.low %v2684_v48, %v2688_v49  ;;  %v2679_v48 = vld [vmem:[#allocation11 + $0x158] sm:$0xff] }
 0x807   :  { %3101 = vmatprep.subr.bf16.mxu1 %v3522_v60  ;;  %v2693_v60 = vld [vmem:[#allocation11 + $0x1c8] sm:$0xff]  ;;  %v2683_v49 = vld [vmem:[#allocation11 + $0x178] sm:$0xff] }
 0x808   :  { %v3566_v53 = vcombine.high %v2679_v48, %v2683_v49 }
 0x8bc   :  { %v2449_v34 = vpop.f32.mrb[28].mxu1 }
 0x8bd   :  { %v2454_v37 = vrot.slane %v2449_v34, 2  ;;  %v2455_v36 = vrot.slane %v2449_v34, 3  ;;  %v3913_v38 = vpop.f32.mrb[29].mxu1  ;;  %v2673_v34 = vld [vmem:[#allocation11 + $0x128] sm:$0xff] }
 0x8be   :  { %v3554_v38 = vcombine.high %v2669_v33, %v2673_v34 }
 0x8bf   :  { %v2458_v39 = vadd.f32 %v2454_v37, %v4778_v30  ;;  %v2459_v40 = vadd.f32 %v2455_v36, %v4776_v28  ;;  %v3551_v37 = vcombine.low %v2668_v5, %v2672_v6  ;;  %v3553_v36 = vcombine.low %v2669_v33, %v2673_v34  ;;  %v2666_v5 = vld [vmem:[#allocation11 + $0xf0] sm:$0xff]  ;;  %v2663_v6 = vld [vmem:[#allocation11 + $0xd8] sm:$0xff] }
 0x8c0   :  { %v2667_v33 = vld [vmem:[#allocation11 + $0xf8] sm:$0xff]  ;;  %v3541_v34 = vcombine.low %v2655_v2, %v2659_v27 }
 0x8c1   :  { %4297 = vtanh.f32 %v2458_v39  ;;  %v2676_v39 = vld [vmem:[#allocation11 + $0x140] sm:$0xff] }
 0x8c2   :  { %4299 = vtanh.f32 %v2459_v40  ;;  %v2680_v40 = vld [vmem:[#allocation11 + $0x160] sm:$0xff] }
 0x8cb   :  { %v4298_v41 = vpop.eup %4297 }
 0x8cc   :  { %v4300_v42 = vpop.eup %4299  ;;  %v2464_v43 = vrot.slane %v4298_v41, 6  ;;  %v2677_v41 = vld [vmem:[#allocation11 + $0x148] sm:$0xff] }
 0x8cd   :  { %v2465_v44 = vrot.slane %v4300_v42, 5  ;;  %v3560_v42 = vcombine.high %v2676_v39, %v2680_v40 }
 0x8cf   :  { %v2466_v46 = vsel %vm2149_vm3, %v2465_v44, %v2464_v43  ;;  %v2681_v43 = vld [vmem:[#allocation11 + $0x168] sm:$0xff]  ;;  %v3559_v44 = vcombine.low %v2676_v39, %v2680_v40  ;;  %v2674_v39 = vld [vmem:[#allocation11 + $0x130] sm:$0xff]  ;;  %v2671_v40 = vld [vmem:[#allocation11 + $0x118] sm:$0xff] }
 0x8d0   :  { %3931 = vmatmul.mubr.f32.vlgmr.msra.gmra.mrb[10].mxu0 %v2466_v46  ;;  %v3561_v46 = vcombine.low %v2677_v41, %v2681_v43  ;;  %v3562_v47 = vcombine.high %v2677_v41, %v2681_v43  ;;  %v2675_v41 = vld [vmem:[#allocation11 + $0x138] sm:$0xff]  ;;  %v3549_v43 = vcombine.low %v2663_v6, %v2667_v33 }
 0x8d1   :  { %3094 = vmatprep.mubr.f32.mxu0 %v4487_v58  ;;  %3063 = vmatpush1.bf16.msra.mxu0 %v3519_v55  ;;  %v2696_v55 = vld [vmem:[#allocation11 + $0x1e0] sm:$0xff] }
 0x8d2   :  { %3064 = vmatprep.subr.bf16.mxu0 %v3528_v18 }
 0x9a3   :  { %v2502_v62 = vpop.f32.mrb[10].mxu0 }
 0x9a4   :  { %v2507_v63 = vrot.slane %v2502_v62, 1  ;;  %v2508_v0 = vrot.slane %v2502_v62, 2  ;;  %v3932_v7 = vpop.f32.mrb[11].mxu0  ;;  %v2697_v62 = vld [vmem:[#allocation11 + $0x1e8] sm:$0xff] }
 0x9a5   :  { %v2642_v7 = vld [vmem:[#allocation11 + $0x30] sm:$0xff] }
 0x9a6   :  { %v2511_v8 = vadd.f32 %v2507_v63, %v4778_v30  ;;  %v2512_v9 = vadd.f32 %v2508_v0, %v4776_v28  ;;  %v3527_v30 = vcombine.low %v2644_v15, %v2648_v16  ;;  %v3530_v28 = vcombine.high %v2645_v17, %v2649_v19  ;;  %v2638_v63 = vld [vmem:[#allocation11 + $0x10] sm:$0xff]  ;;  %v3509_v16 = vld [vmem:[%s4936_s6] ss:$0 sm:$0xff] }
 0x9a7   :  { %v3578_v0 = vcombine.high %v2693_v60, %v2697_v62 }
 0x9a8   :  { %4301 = vtanh.f32 %v2511_v8  ;;  %3065 = vmatpush1.bf16.msra.mxu0 %v3527_v30  ;;  %v2639_v8 = vld [vmem:[#allocation11 + $0x18] sm:$0xff] }
 0x9a9   :  { %4303 = vtanh.f32 %v2512_v9  ;;  %3066 = vmatprep.subr.bf16.mxu0 %v3536_v24  ;;  %v2643_v9 = vld [vmem:[#allocation11 + $0x38] sm:$0xff] }
 0x9aa   :  { %v3526_v15 = vcombine.high %v2639_v8, %v2643_v9  ;;  %v2651_v24 = vld [vmem:[#allocation11 + $0x78] sm:$0xff] }
 0x9ab   :  { %v3533_v29 = vcombine.low %v2647_v23, %v2651_v24 }
 0x9ac   :  { %3067 = vmatpush1.bf16.msra.mxu0 %v3535_v26  ;;  %v3534_v26 = vcombine.high %v2647_v23, %v2651_v24 }
 0x9ad   :  { %3068 = vmatprep.subr.bf16.mxu0 %v3544_v3  ;;  %v3531_v3 = vcombine.low %v2646_v21, %v2650_v22 }
 0x9b0   :  { %3069 = vmatpush1.bf16.msra.mxu0 %v3543_v4 }
 0x9b1   :  { %3070 = vmatprep.subr.bf16.mxu0 %v3552_v35 }
 0x9b2   :  { %v4302_v10 = vpop.eup %4301 }
 0x9b3   :  { %v4304_v12 = vpop.eup %4303  ;;  %v2540_v13 = vrot.slane %v4302_v10, 7  ;;  %v3575_v10 = vcombine.low %v2692_v54, %v2696_v55 }
 0x9b4   :  { %v2541_v14 = vrot.slane %v4304_v12, 6  ;;  %3071 = vmatpush1.bf16.msra.mxu0 %v3551_v37  ;;  %v3523_v12 = vcombine.low %v2638_v63, %v2642_v7 }
 0x9b5   :  { %3072 = vmatprep.subr.bf16.mxu0 %v3560_v42 }
 0x9b6   :  { %v2542_v11 = vsel %vm2149_vm3, %v2541_v14, %v2540_v13  ;;  %v3525_v13 = vcombine.low %v2639_v8, %v2643_v9  ;;  %v3577_v14 = vcombine.low %v2693_v60, %v2697_v62  ;;  %v3565_v60 = vcombine.low %v2679_v48, %v2683_v49  ;;  %v2695_v8 = vld [vmem:[#allocation11 + $0x1d8] sm:$0xff] }
 0x9b7   :  { %3950 = vmatmul.mubr.f32.vlgmr.msra.gmra.mrb[30].mxu1 %v2542_v11  ;;  %v3524_v11 = vcombine.high %v2638_v63, %v2642_v7  ;;  %v2698_v7 = vld [vmem:[#allocation11 + $0x1f0] sm:$0xff]  ;;  %v2699_v9 = vld [vmem:[#allocation11 + $0x1f8] sm:$0xff] }
 0x9b8   :  { %3102 = vmatpush1.bf16.msra.mxu1 %v3521_v59  ;;  %3133 = vmatprep.mubr.f32.mxu1 %v4487_v58  ;;  %v3576_v59 = vcombine.high %v2692_v54, %v2696_v55  ;;  %v2686_v54 = vld [vmem:[#allocation11 + $0x190] sm:$0xff] }
 0x9b9   :  { %3103 = vmatprep.subr.bf16.mxu1 %v3530_v28  ;;  %3073 = vmatpush1.bf16.msra.mxu0 %v3559_v44  ;;  %v2690_v55 = vld [vmem:[#allocation11 + $0x1b0] sm:$0xff] }
 0x9ba   :  { %3074 = vmatprep.subr.bf16.mxu0 %v3568_v52  ;;  %v3572_v62 = vcombine.high %v2686_v54, %v2690_v55 }
 0x9bc   :  { %3104 = vmatpush1.bf16.msra.mxu1 %v3529_v20 }
 0x9bd   :  { %3105 = vmatprep.subr.bf16.mxu1 %v3538_v61  ;;  %3075 = vmatpush1.bf16.msra.mxu0 %v3567_v51  ;;  %v3557_v51 = vcombine.low %v2671_v40, %v2675_v41 }
 0x9be   :  { %3076 = vmatprep.subr.bf16.mxu0 %v3576_v59 }
 0x9c0   :  { %3106 = vmatpush1.bf16.msra.mxu1 %v3537_v57  ;;  %v2654_v57 = vld [vmem:[#allocation11 + $0x90] sm:$0xff] }
 0x9c1   :  { %3107 = vmatprep.subr.bf16.mxu1 %v3546_v32  ;;  %3077 = vmatpush1.bf16.msra.mxu0 %v3575_v10  ;;  %v3540_v4 = vcombine.high %v2654_v57, %v2658_v1  ;;  %v2662_v32 = vld [vmem:[#allocation11 + $0xd0] sm:$0xff]  ;;  %v3539_v35 = vcombine.low %v2654_v57, %v2658_v1  ;;  %v3571_v10 = vcombine.low %v2686_v54, %v2690_v55 }
 0x9c2   :  { %3140 = vmatprep.subr.bf16.mxu0 %v3524_v11  ;;  %v3548_v37 = vcombine.high %v2662_v32, %v2666_v5  ;;  %v3547_v42 = vcombine.low %v2662_v32, %v2666_v5 }
 0x9c4   :  { %3108 = vmatpush1.bf16.msra.mxu1 %v3545_v31  ;;  %v3542_v31 = vcombine.high %v2655_v2, %v2659_v27 }
 0x9c5   :  { %3109 = vmatprep.subr.bf16.mxu1 %v3554_v38  ;;  %v2670_v38 = vld [vmem:[#allocation11 + $0x110] sm:$0xff] }
 0x9c6   :  { %v3556_v44 = vcombine.high %v2670_v38, %v2674_v39  ;;  %v3555_v50 = vcombine.low %v2670_v38, %v2674_v39 }
 0x9c8   :  { %3110 = vmatpush1.bf16.msra.mxu1 %v3553_v36  ;;  %v3550_v36 = vcombine.high %v2663_v6, %v2667_v33 }
 0x9c9   :  { %3111 = vmatprep.subr.bf16.mxu1 %v3562_v47  ;;  %v2682_v47 = vld [vmem:[#allocation11 + $0x170] sm:$0xff] }
 0x9cc   :  { %3112 = vmatpush1.bf16.msra.mxu1 %v3561_v46  ;;  %v2678_v46 = vld [vmem:[#allocation11 + $0x150] sm:$0xff] }
 0x9cd   :  { %3113 = vmatprep.subr.bf16.mxu1 %v3570_v45  ;;  %v3564_v52 = vcombine.high %v2678_v46, %v2682_v47  ;;  %v2691_v45 = vld [vmem:[#allocation11 + $0x1b8] sm:$0xff]  ;;  %v3563_v59 = vcombine.low %v2678_v46, %v2682_v47 }
 0x9d0   :  { %3114 = vmatpush1.bf16.msra.mxu1 %v3569_v56  ;;  %v2687_v56 = vld [vmem:[#allocation11 + $0x198] sm:$0xff] }
 0x9d1   :  { %3115 = vmatprep.subr.bf16.mxu1 %v3578_v0  ;;  %v3574_v63 = vcombine.high %v2687_v56, %v2691_v45  ;;  %v2694_v0 = vld [vmem:[#allocation11 + $0x1d0] sm:$0xff] }
 0x9d2   :  { %v3579_v11 = vcombine.low %v2694_v0, %v2698_v7 }
 0x9d4   :  { %3116 = vmatpush1.bf16.msra.mxu1 %v3577_v14  ;;  %v3582_v14 = vcombine.high %v2695_v8, %v2699_v9 }
 0x9d5   :  { %3179 = vmatprep.subr.bf16.mxu1 %v3526_v15  ;;  %v3581_v15 = vcombine.low %v2695_v8, %v2699_v9 }
 0xa8a   :  { %v2626_v17 = vpop.f32.mrb[30].mxu1 }
 0xa8b   :  { %v2627_v18 = vadd.f32 %v3509_v16, %v2626_v17  ;;  %v3951_v19 = vpop.f32.mrb[31].mxu1  ;;  %v2702_v16 = vlaneseq }
 0xa8d   :  { %v3518_v30 = vmul.f32 -1.442695, %v2627_v18  ;;  %v2703_v17 = vshrl.u32 %v2702_v16, 7 }
 0xa8f   :  { %4305 = vpow2.f32 %v3518_v30  ;;  %v2704_v18 = vsub.s32 0, %v2703_v17  ;;  %v2712_v19 = vsub.s32 2, %v2703_v17  ;;  %v2700_v30 = vld [vmem:[%s4938_s8] sm:$0xff]  ;;  %v2716_v22 = vsub.s32 3, %v2703_v17  ;;  %s4490_s8 = smov [#allocation13]  }
 0xa90   :  { %v2724_v38 = vsub.s32 5, %v2703_v17  ;;  %v2732_v39 = vsub.s32 7, %v2703_v17  ;;  %s3270_s21 = sshll.u32 %s4490_s8, 4  ;;  %s3271_s21 = int_to_ptr.vmem [resolvable:$true] %s3270_s21 }
 0xa91   :  { %v2705_v23 = vrot.slane %v2700_v30, %v2704_v18  ;;  %v2713_v24 = vrot.slane %v2700_v30, %v2712_v19  ;;  %v2717_v57 = vrot.slane %v2700_v30, %v2716_v22  ;;  %s4441_s22 = scalar_lea.vmem %s3271_s21, 256  ;;  %p4446_p7 = scmp.lt.s32.totalorder %s3271_s21, %s3271_s21 }
 0xa92   :  { %p4442_p6 = scmp.ne.s32.totalorder %s3271_s21, %s4441_s22  ;;  %p4447_p8 = scmp.lt.s32.totalorder %s4441_s22, %s4441_s22 }
 0xa94   :  { %p4448_p9 = por %p4447_p8, %p4446_p7 }
 0xa96   :  { %p4449_p10 = pnand %p4448_p9, %p4442_p6 }
 0xa99   :  { %v4306_v20 = vpop.eup %4305 }
 0xa9a   :  { %v2633_v28 = vadd.f32 1.0, %v4306_v20  ;;  %v2708_v20 = vsub.s32 1, %v2703_v17 }
 0xa9c   :  { %4307 = vrcp.f32 %v2633_v28  ;;  %v4489_v28 = vmov 1983009808  }
 0xa9d   :  { %v3229_v21 = vunpack.c.l.s4 %v4489_v28 }
 0xaa6   :  { %v4907_v61 = vpop.eup %4307 }
 0xaa7   :  { %3095 = vmatmul.mubr.f32.vlgmr.msra.gmra.mrb[12].mxu0 %v4907_v61  ;;  %3134 = vmatmul.mubr.f32.vlgmr.msra.gmra.mrb[32].mxu1 %v4907_v61 }
 0xaa8   :  { %3141 = vmatpush1.bf16.msra.mxu0 %v3523_v12  ;;  %3180 = vmatpush1.bf16.msra.mxu1 %v3525_v13  ;;  %v3573_v12 = vcombine.low %v2687_v56, %v2691_v45  ;;  %v3580_v13 = vcombine.high %v2694_v0, %v2698_v7 }
 0xaa9   :  { %3142 = vmatprep.subr.bf16.mxu0 %v3532_v25  ;;  %3181 = vmatprep.subr.bf16.mxu1 %v3534_v26  ;;  %v2709_v25 = vrot.slane %v2700_v30, %v2708_v20  ;;  %v3230_v26 = vunpack.c.0.s8 %v3229_v21 }
 0xaaa   :  { %3172 = vmatprep.mubr.f32.mxu0 %v4487_v58  ;;  %3211 = vmatprep.mubr.f32.mxu1 %v4487_v58  ;;  %v3558_v58 = vcombine.high %v2671_v40, %v2675_v41 }
 0xaac   :  { %3143 = vmatpush1.bf16.msra.mxu0 %v3531_v3  ;;  %3182 = vmatpush1.bf16.msra.mxu1 %v3533_v29 }
 0xaad   :  { %3144 = vmatprep.subr.bf16.mxu0 %v3540_v4  ;;  %3183 = vmatprep.subr.bf16.mxu1 %v3542_v31  ;;  %v3233_v31 = vsub.s32 %v3230_v26, %v2703_v17 }
 0xab0   :  { %3145 = vmatpush1.bf16.msra.mxu0 %v3539_v35  ;;  %3184 = vmatpush1.bf16.msra.mxu1 %v3541_v34 }
 0xab1   :  { %3146 = vmatprep.subr.bf16.mxu0 %v3548_v37  ;;  %3185 = vmatprep.subr.bf16.mxu1 %v3550_v36  ;;  %v2720_v37 = vsub.s32 4, %v2703_v17  ;;  %v2728_v36 = vsub.s32 6, %v2703_v17 }
 0xab3   :  { %v2721_v40 = vrot.slane %v2700_v30, %v2720_v37  ;;  %v2729_v41 = vrot.slane %v2700_v30, %v2728_v36 }
 0xab4   :  { %3147 = vmatpush1.bf16.msra.mxu0 %v3547_v42  ;;  %3186 = vmatpush1.bf16.msra.mxu1 %v3549_v43  ;;  %v2725_v42 = vrot.slane %v2700_v30, %v2724_v38  ;;  %v2733_v43 = vrot.slane %v2700_v30, %v2732_v39 }
 0xab5   :  { %3148 = vmatprep.subr.bf16.mxu0 %v3556_v44  ;;  %3187 = vmatprep.subr.bf16.mxu1 %v3558_v58 }
 0xab8   :  { %3149 = vmatpush1.bf16.msra.mxu0 %v3555_v50  ;;  %3188 = vmatpush1.bf16.msra.mxu1 %v3557_v51 }
 0xab9   :  { %3150 = vmatprep.subr.bf16.mxu0 %v3564_v52  ;;  %3189 = vmatprep.subr.bf16.mxu1 %v3566_v53 }
 0xabc   :  { %3151 = vmatpush1.bf16.msra.mxu0 %v3563_v59  ;;  %3190 = vmatpush1.bf16.msra.mxu1 %v3565_v60 }
 0xabd   :  { %3152 = vmatprep.subr.bf16.mxu0 %v3572_v62  ;;  %3191 = vmatprep.subr.bf16.mxu1 %v3574_v63 }
 0xac0   :  { %3153 = vmatpush1.bf16.msra.mxu0 %v3571_v10  ;;  %3192 = vmatpush1.bf16.msra.mxu1 %v3573_v12 }
 0xac1   :  { %3154 = vmatprep.subr.bf16.mxu0 %v3580_v13  ;;  %3193 = vmatprep.subr.bf16.mxu1 %v3582_v14 }
 0xac4   :  { %3155 = vmatpush1.bf16.msra.mxu0 %v3579_v11  ;;  %3194 = vmatpush1.bf16.msra.mxu1 %v3581_v15 }
 0xac7   :  { %3173 = vmatmul.mubr.f32.vlgmr.msra.gmra.mrb[14].mxu0 %v4907_v61  ;;  %3212 = vmatmul.mubr.f32.vlgmr.msra.gmra.mrb[34].mxu1 %v4907_v61 }
 0xb7a   :  { %v3096_v1 = vpop.f32.mrb[12].mxu0  ;;  %v3135_v2 = vpop.f32.mrb[32].mxu1 }
 0xb7b   :  { %v3097_v61 = vadd.f32 %v3096_v1, %v2705_v23  ;;  %v3136_v27 = vadd.f32 %v3135_v2, %v2713_v24  ;;  %v3098_v3 = vpop.f32.mrb[13].mxu0  ;;  %v3137_v29 = vpop.f32.mrb[33].mxu1 }
 0xb7c   :  { %v3099_v4 = vadd.f32 %v3098_v3, %v2709_v25  ;;  %v3138_v32 = vadd.f32 %v3137_v29, %v2717_v57 }
 0xb7e   :  { %v3226_v5 = vcombine.low %v3097_v61, %v3099_v4  ;;  %v3227_v6 = vcombine.low %v3136_v27, %v3138_v32 }
 0xb80   :  { %v3234_v33 = vrot.slane %v3226_v5, %v3233_v31  ;;  %v3241_v35 = vrot.slane %v3227_v6, %v3233_v31 }
 0xb82   :  { %v3242_v34 = vcombine.low %v3234_v33, %v3241_v35 }
 0xb84   :  { %3262 = vst [vmem:[#allocation13] sm:$0xff] %v3242_v34 }
 0xb9a   :  { %v3174_v44 = vpop.f32.mrb[14].mxu0  ;;  %v3213_v58 = vpop.f32.mrb[34].mxu1 }
 0xb9b   :  { %v3175_v46 = vadd.f32 %v3174_v44, %v2721_v40  ;;  %v3214_v47 = vadd.f32 %v3213_v58, %v2729_v41  ;;  %v3176_v48 = vpop.f32.mrb[15].mxu0  ;;  %v3215_v49 = vpop.f32.mrb[35].mxu1 }
 0xb9c   :  { %v3177_v50 = vadd.f32 %v3176_v48, %v2725_v42  ;;  %v3216_v51 = vadd.f32 %v3215_v49, %v2733_v43 }
 0xb9e   :  { %v3243_v52 = vcombine.low %v3175_v46, %v3177_v50  ;;  %v3244_v53 = vcombine.low %v3214_v47, %v3216_v51 }
 0xba0   :  { %v3251_v54 = vrot.slane %v3243_v52, %v3233_v31  ;;  %v3258_v55 = vrot.slane %v3244_v53, %v3233_v31 }
 0xba2   :  { %v3259_v56 = vcombine.low %v3251_v54, %v3258_v55 }
 0xba4   :  { %3263 = vst [vmem:[#allocation13 + $0x8] sm:$0xff] %v3259_v56 }
 0xba5   :  { %4452 = shalt.err (!%p4449_p10)
}
 0xba6   :  { %s4453_s3 = scalar_lea.hbm %s4939_s9, 256 }
 0xba7   :  { %p4454_p11 = scmp.ne.s32.totalorder %s4939_s9, %s4453_s3  ;;  %p4457_p12 = scmp.lt.u32.totalorder %s4453_s3, %s4939_s9 }
 0xba9   :  { %p4459_p13 = pnand %p4457_p12, %p4454_p11 }
 0xbab   :  { %4462 = shalt.err (!%p4459_p13)
}
 0xbac   :  { %3273 = dma.vmem_to_hbm [thread:$0]  %s3271_s21, 256, %s4939_s9, [#allocation4]  }
 0xbad   :  { %4471 = dma.done.wait [#allocation4], 256  }
 0xbae   :  { %4472 = vsyncadd [#allocation4], 4294967040 }
 0xbaf   :  { %3277 = vsyncpa [#allocation3], 1 }
 0xbb0   :  { %3278 = vsyncpa [#allocation6], 1 }
 0xbb1   :  { %3279 = vsyncpa [#allocation9], 1 }
 0xbb2   :  { %3280 = vsyncpa [#allocation12], 1 }
 0xbb3   :  { %3281 = vsyncpa [#allocation4], 1 }

</bundles_post_ra>
